<compile_context>
chip_gen: v6e
topology: v6e:2x2x1
jax: 0.10.0
libtpu: 0.0.40
codegen_flags: <defaults>
</compile_context>

<pallas_src>
import functools

import jax
import jax.numpy as jnp
from jax import lax
from jax.experimental import pallas as pl
from jax.experimental.pallas import tpu as pltpu

EMBED_SIZE = 384
N_HEAD = 6
HEAD_SIZE = EMBED_SIZE // N_HEAD   # 64
BLOCK_SIZE = 256                   # max sequence length (causal mask buffer size)
                                   # NOTE: if this grows (T >= 1024) switch to a
                                   # query-tiled / streaming-K formulation before
                                   # raising vmem_limit_bytes (v7x has 64 MiB VMEM).


# ---------------------------------------------------------------------------
# Fused kernel: QKV projection + causal attention (all heads) + output proj.
# One grid step = `Bb` batch rows.
# ---------------------------------------------------------------------------
def _heads_kernel(x_ref, wqkv_ref, wproj_ref, bproj_ref, o_ref, *,
                  n_head, head_size):
    # x_ref    : (Bb, T, C)   f32   (cast to bf16 in-kernel)
    # wqkv_ref : (C, 3*H*D)   bf16  columns [Q_all | K_all | V_all], Q pre-scaled
    # wproj_ref: (C, C)       bf16
    # bproj_ref: (1, C)       f32
    # o_ref    : (Bb, T, C)   f32   (384-lane-dense store)
    H, D = n_head, head_size
    Bb, T, C = x_ref.shape

    # Causal (tril) mask, built once per program, reused for every row / head.
    row = lax.broadcasted_iota(jnp.int32, (T, T), 0)
    col = lax.broadcasted_iota(jnp.int32, (T, T), 1)
    causal = col <= row

    def batch_row(b, carry):
        x = x_ref[b].astype(jnp.bfloat16)                       # (T, C)

        # Fused QKV projection: one wide MXU matmul, f32 accumulation.
        # Scale (C**-0.5) is already folded into the Q columns of wqkv.
        qkv = jnp.dot(x, wqkv_ref[...], preferred_element_type=jnp.float32)
        qkv_bf = qkv.astype(jnp.bfloat16)                       # single cast

        acc = jnp.zeros((T, C), jnp.float32)
        for h in range(H):                                      # static unroll
            q = qkv_bf[:, h * D:(h + 1) * D]                    # (T, D)
            k = qkv_bf[:, (H + h) * D:(H + h + 1) * D]
            v = qkv_bf[:, (2 * H + h) * D:(2 * H + h + 1) * D]

            # scores = (q*scale) @ k^T ; transposed contraction, no k.T copy.
            s = lax.dot_general(q, k,
                                dimension_numbers=(((1,), (1,)), ((), ())),
                                preferred_element_type=jnp.float32)  # (T, T)
            s = jnp.where(causal, s, -jnp.inf)

            # softmax along last axis (f32 VPU/EUP path).
            s = s - jnp.max(s, axis=-1, keepdims=True)
            p = jnp.exp(s)
            p = p * pl.reciprocal(jnp.sum(p, axis=-1, keepdims=True), approx=True)
            # TODO(synk): dropout(p=0.2) on attention weights skipped (eval mode).

            head_out = jnp.dot(p.astype(jnp.bfloat16), v,
                               preferred_element_type=jnp.float32)   # (T, D)

            # Per-head slab of the output projection: (T,D)@(D,C) keeps the MXU
            # output 384-lane dense and avoids the head concat entirely.
            acc = acc + jnp.dot(head_out.astype(jnp.bfloat16),
                                wproj_ref[h * D:(h + 1) * D, :],
                                preferred_element_type=jnp.float32)

        # TODO(synk): dropout(p=0.2) on the projection output skipped (eval mode).
        # NOTE: emit bf16 here (and in out_shape) if the consumer takes bf16 to
        # halve the HBM writeback.
        o_ref[b] = (acc + bproj_ref[...]).astype(o_ref.dtype)
        return carry

    lax.fori_loop(0, Bb, batch_row, 0)


# ---------------------------------------------------------------------------
# One-time parameter packing (hoisted off the per-call critical path).
# ---------------------------------------------------------------------------
def pack_heads_params(wq, wk, wv, w_proj, b_proj):
    """wq/wk/wv: (H, C, D) laid out so q = x @ wq[h]; w_proj: (C, C); b_proj: (C,).

    Returns bf16-packed weights with the attention scale (C**-0.5, matching the
    PyTorch module's Channels**-0.5) folded into the Q columns.
    """
    H, C, D = wq.shape
    scale = float(C) ** -0.5
    w_qkv = jnp.concatenate(
        [
            jnp.transpose(wq, (1, 0, 2)).reshape(C, H * D) * scale,  # Q (pre-scaled)
            jnp.transpose(wk, (1, 0, 2)).reshape(C, H * D),          # K
            jnp.transpose(wv, (1, 0, 2)).reshape(C, H * D),          # V
        ],
        axis=1,
    ).astype(jnp.bfloat16)                                           # (C, 3*H*D)
    w_proj_bf = w_proj.astype(jnp.bfloat16)                          # (C, C)
    b_proj2 = b_proj.reshape(1, C).astype(jnp.float32)               # (1, C)
    return w_qkv, w_proj_bf, b_proj2


# ---------------------------------------------------------------------------
# Forward wrappers
# ---------------------------------------------------------------------------
@functools.partial(jax.jit, static_argnames=("batch_block",))
def heads_forward_packed(x, w_qkv, w_proj_bf, b_proj2, *, batch_block=None):
    """x: (B, T, C) f32; packed weights from pack_heads_params."""
    B, T, C = x.shape
    H = N_HEAD
    D = C // H

    # Batch-row blocking: amortize per-grid-step overhead (largest divisor <= 8).
    if batch_block is None:
        bb = max(d for d in range(1, min(B, 8) + 1) if B % d == 0)
    else:
        bb = batch_block
    assert B % bb == 0

    kernel = functools.partial(_heads_kernel, n_head=H, head_size=D)

    return pl.pallas_call(
        kernel,
        out_shape=jax.ShapeDtypeStruct((B, T, C), x.dtype),
        grid_spec=pltpu.PrefetchScalarGridSpec(
            num_scalar_prefetch=0,
            grid=(B // bb,),
            in_specs=[
                pl.BlockSpec((bb, T, C), lambda i: (i, 0, 0)),       # x rows
                pl.BlockSpec((C, 3 * H * D), lambda i: (0, 0)),      # fused QKV W
                pl.BlockSpec((C, C), lambda i: (0, 0)),              # proj W
                pl.BlockSpec((1, C), lambda i: (0, 0)),              # proj bias
            ],
            out_specs=pl.BlockSpec((bb, T, C), lambda i: (i, 0, 0)),
        ),
        compiler_params=pltpu.CompilerParams(
            dimension_semantics=("parallel",)),
    )(x, w_qkv, w_proj_bf, b_proj2)


def heads_forward(x, wq, wk, wv, w_proj, b_proj):
    """Convenience wrapper: packs weights then calls the fused kernel.
    Prefer packing once with pack_heads_params() and reusing across calls."""
    packed = pack_heads_params(wq, wk, wv, w_proj, b_proj)
    return heads_forward_packed(x, *packed)


# pure-JAX f32 reference for correctness checking
def heads_reference(x, wq, wk, wv, w_proj, b_proj):
    B, T, C = x.shape
    q = jnp.einsum("btc,hcd->hbtd", x, wq)
    k = jnp.einsum("btc,hcd->hbtd", x, wk)
    v = jnp.einsum("btc,hcd->hbtd", x, wv)
    s = jnp.einsum("hbtd,hbsd->hbts", q, k) * (float(C) ** -0.5)
    mask = jnp.tril(jnp.ones((T, T), bool))
    s = jnp.where(mask, s, -jnp.inf)
    p = jax.nn.softmax(s, axis=-1)
    o = jnp.einsum("hbts,hbsd->hbtd", p, v)
    cat = jnp.transpose(o, (1, 2, 0, 3)).reshape(B, T, C)
    return cat @ w_proj + b_proj


if __name__ == "__main__":
    key = jax.random.PRNGKey(0)
    k_x, k_q, k_k, k_v, k_p, k_b = jax.random.split(key, 6)

    B, T = 2, 16                     # T <= block_size (256)
    C, H, D = EMBED_SIZE, N_HEAD, HEAD_SIZE

    x = jax.random.normal(k_x, (B, T, C), dtype=jnp.float32)

    # deterministic synthetic parameters (PyTorch Linear weight is (out,in);
    # we store the transpose (in,out) so the kernel does x @ W).
    wq = jax.random.normal(k_q, (H, C, D), dtype=jnp.float32) * 0.02
    wk = jax.random.normal(k_k, (H, C, D), dtype=jnp.float32) * 0.02
    wv = jax.random.normal(k_v, (H, C, D), dtype=jnp.float32) * 0.02
    w_proj = jax.random.normal(k_p, (C, C), dtype=jnp.float32) * 0.02
    b_proj = jax.random.normal(k_b, (C,), dtype=jnp.float32) * 0.02

    # One-time packing (off the per-forward critical path), then the fused kernel.
    packed = pack_heads_params(wq, wk, wv, w_proj, b_proj)
    out = heads_forward_packed(x, *packed)
    out = jax.block_until_ready(out)

    ref = heads_reference(x, wq, wk, wv, w_proj, b_proj)
    assert out.shape == (B, T, C)
    # bf16 MXU operands + approx reciprocal => loosened tolerance vs f32 reference
    assert jnp.allclose(out, ref, atol=2e-2, rtol=2e-2), "mismatch vs reference"

    print("KERNEL_OK")
</pallas_src>

<mosaic_0001>
module attributes {stable_mosaic.version = 11 : i64} {
  func.func @_heads_kernel(%arg0: i32, %arg1: memref<2x16x384xf32, #tpu.memory_space<vmem>>, %arg2: memref<384x1152xbf16, #tpu.memory_space<vmem>>, %arg3: memref<384x384xbf16, #tpu.memory_space<vmem>>, %arg4: memref<1x384xf32, #tpu.memory_space<vmem>>, %arg5: memref<2x16x384xf32, #tpu.memory_space<vmem>>) attributes {dimension_semantics = [#tpu.dimension_semantics<parallel>], iteration_bounds = array<i64: 1>, scalar_prefetch = 0 : i64, scratch_operands = 0 : i64, tpu.core_type = #tpu.core_type<tc>, window_params = [{transform_indices = @transform_0, window_bounds = array<i64: 2, 16, 384>}, {pipeline_mode = #tpu.pipeline_mode<synchronous>, transform_indices = @transform_1, window_bounds = array<i64: 384, 1152>}, {pipeline_mode = #tpu.pipeline_mode<synchronous>, transform_indices = @transform_2, window_bounds = array<i64: 384, 384>}, {pipeline_mode = #tpu.pipeline_mode<synchronous>, transform_indices = @transform_3, window_bounds = array<i64: 1, 384>}, {transform_indices = @transform_4, window_bounds = array<i64: 2, 16, 384>}]} {
    %0 = tpu.iota {dimensions = array<i32: 0>} : vector<16x16xi32>
    %1 = tpu.iota {dimensions = array<i32: 1>} : vector<16x16xi32>
    %2 = arith.cmpi sle, %1, %0 : vector<16x16xi32>
    %c0_i32 = arith.constant 0 : i32
    %c2_i32 = arith.constant 2 : i32
    %3 = arith.addi %c0_i32, %c2_i32 : i32
    %c1_i32 = arith.constant 1 : i32
    scf.for %arg6 = %c0_i32 to %3 step %c1_i32  : i32 {
      %4 = arith.index_cast %arg6 : i32 to index
      %c0 = arith.constant 0 : index
      %c0_1 = arith.constant 0 : index
      %5 = vector.load %arg1[%4, %c0, %c0_1] : memref<2x16x384xf32, #tpu.memory_space<vmem>>, vector<1x16x384xf32>
      %6 = vector.shape_cast %5 : vector<1x16x384xf32> to vector<16x384xf32>
      %7 = arith.truncf %6 : vector<16x384xf32> to vector<16x384xbf16>
      %c0_2 = arith.constant 0 : index
      %c0_3 = arith.constant 0 : index
      %8 = vector.load %arg2[%c0_2, %c0_3] : memref<384x1152xbf16, #tpu.memory_space<vmem>>, vector<384x1152xbf16>
      %cst = arith.constant dense<0.000000e+00> : vector<16x1152xf32>
      %9 = tpu.matmul %7, %8, %cst {dimension_numbers = #tpu.dot_dimension_numbers<[1], [0], [0], [1], [0, 0, 1, 1], [], []>} : vector<16x384xbf16>, vector<384x1152xbf16>, vector<16x1152xf32> -> vector<16x1152xf32>
      %10 = arith.truncf %9 : vector<16x1152xf32> to vector<16x1152xbf16>
      %cst_4 = arith.constant 0.000000e+00 : f32
      %11 = vector.broadcast %cst_4 : f32 to vector<16x384xf32>
      %12 = vector.extract_strided_slice %10 {offsets = [0, 0], sizes = [16, 64], strides = [1, 1]} : vector<16x1152xbf16> to vector<16x64xbf16>
      %13 = vector.extract_strided_slice %10 {offsets = [0, 384], sizes = [16, 64], strides = [1, 1]} : vector<16x1152xbf16> to vector<16x64xbf16>
      %14 = vector.extract_strided_slice %10 {offsets = [0, 768], sizes = [16, 64], strides = [1, 1]} : vector<16x1152xbf16> to vector<16x64xbf16>
      %cst_5 = arith.constant dense<0.000000e+00> : vector<16x16xf32>
      %15 = tpu.matmul %12, %13, %cst_5 {dimension_numbers = #tpu.dot_dimension_numbers<[1], [1], [0], [0], [0, 0, 1, 0], [], []>} : vector<16x64xbf16>, vector<16x64xbf16>, vector<16x16xf32> -> vector<16x16xf32>
      %cst_6 = arith.constant 0xFF800000 : f32
      %16 = vector.broadcast %cst_6 : f32 to vector<16x16xf32>
      %17 = arith.select %2, %15, %16 : vector<16x16xi1>, vector<16x16xf32>
      %cst_7 = arith.constant dense<0xFF800000> : vector<16xf32>
      %18 = vector.multi_reduction <maximumf>, %17, %cst_7 [1] : vector<16x16xf32> to vector<16xf32>
      %19 = vector.shape_cast %18 : vector<16xf32> to vector<16x1xf32>
      %20 = vector.broadcast %19 : vector<16x1xf32> to vector<16x16xf32>
      %21 = arith.subf %17, %20 : vector<16x16xf32>
      %22 = math.exp %21 : vector<16x16xf32>
      %cst_8 = arith.constant dense<0.000000e+00> : vector<16xf32>
      %23 = vector.multi_reduction <add>, %22, %cst_8 [1] : vector<16x16xf32> to vector<16xf32>
      %24 = vector.shape_cast %23 : vector<16xf32> to vector<16x1xf32>
      %25 = tpu.reciprocal %24 {approx = true} : vector<16x1xf32> -> vector<16x1xf32>
      %26 = vector.broadcast %25 : vector<16x1xf32> to vector<16x16xf32>
      %27 = arith.mulf %22, %26 : vector<16x16xf32>
      %28 = arith.truncf %27 : vector<16x16xf32> to vector<16x16xbf16>
      %cst_9 = arith.constant dense<0.000000e+00> : vector<16x64xf32>
      %29 = tpu.matmul %28, %14, %cst_9 {dimension_numbers = #tpu.dot_dimension_numbers<[1], [0], [0], [1], [0, 0, 1, 1], [], []>} : vector<16x16xbf16>, vector<16x64xbf16>, vector<16x64xf32> -> vector<16x64xf32>
      %30 = arith.truncf %29 : vector<16x64xf32> to vector<16x64xbf16>
      %c0_10 = arith.constant 0 : index
      %c0_11 = arith.constant 0 : index
      %31 = vector.load %arg3[%c0_10, %c0_11] : memref<384x384xbf16, #tpu.memory_space<vmem>>, vector<64x384xbf16>
      %cst_12 = arith.constant dense<0.000000e+00> : vector<16x384xf32>
      %32 = tpu.matmul %30, %31, %cst_12 {dimension_numbers = #tpu.dot_dimension_numbers<[1], [0], [0], [1], [0, 0, 1, 1], [], []>} : vector<16x64xbf16>, vector<64x384xbf16>, vector<16x384xf32> -> vector<16x384xf32>
      %33 = arith.addf %11, %32 : vector<16x384xf32>
      %34 = vector.extract_strided_slice %10 {offsets = [0, 64], sizes = [16, 64], strides = [1, 1]} : vector<16x1152xbf16> to vector<16x64xbf16>
      %35 = vector.extract_strided_slice %10 {offsets = [0, 448], sizes = [16, 64], strides = [1, 1]} : vector<16x1152xbf16> to vector<16x64xbf16>
      %36 = vector.extract_strided_slice %10 {offsets = [0, 832], sizes = [16, 64], strides = [1, 1]} : vector<16x1152xbf16> to vector<16x64xbf16>
      %cst_13 = arith.constant dense<0.000000e+00> : vector<16x16xf32>
      %37 = tpu.matmul %34, %35, %cst_13 {dimension_numbers = #tpu.dot_dimension_numbers<[1], [1], [0], [0], [0, 0, 1, 0], [], []>} : vector<16x64xbf16>, vector<16x64xbf16>, vector<16x16xf32> -> vector<16x16xf32>
      %cst_14 = arith.constant 0xFF800000 : f32
      %38 = vector.broadcast %cst_14 : f32 to vector<16x16xf32>
      %39 = arith.select %2, %37, %38 : vector<16x16xi1>, vector<16x16xf32>
      %cst_15 = arith.constant dense<0xFF800000> : vector<16xf32>
      %40 = vector.multi_reduction <maximumf>, %39, %cst_15 [1] : vector<16x16xf32> to vector<16xf32>
      %41 = vector.shape_cast %40 : vector<16xf32> to vector<16x1xf32>
      %42 = vector.broadcast %41 : vector<16x1xf32> to vector<16x16xf32>
      %43 = arith.subf %39, %42 : vector<16x16xf32>
      %44 = math.exp %43 : vector<16x16xf32>
      %cst_16 = arith.constant dense<0.000000e+00> : vector<16xf32>
      %45 = vector.multi_reduction <add>, %44, %cst_16 [1] : vector<16x16xf32> to vector<16xf32>
      %46 = vector.shape_cast %45 : vector<16xf32> to vector<16x1xf32>
      %47 = tpu.reciprocal %46 {approx = true} : vector<16x1xf32> -> vector<16x1xf32>
      %48 = vector.broadcast %47 : vector<16x1xf32> to vector<16x16xf32>
      %49 = arith.mulf %44, %48 : vector<16x16xf32>
      %50 = arith.truncf %49 : vector<16x16xf32> to vector<16x16xbf16>
      %cst_17 = arith.constant dense<0.000000e+00> : vector<16x64xf32>
      %51 = tpu.matmul %50, %36, %cst_17 {dimension_numbers = #tpu.dot_dimension_numbers<[1], [0], [0], [1], [0, 0, 1, 1], [], []>} : vector<16x16xbf16>, vector<16x64xbf16>, vector<16x64xf32> -> vector<16x64xf32>
      %52 = arith.truncf %51 : vector<16x64xf32> to vector<16x64xbf16>
      %c64 = arith.constant 64 : index
      %c0_18 = arith.constant 0 : index
      %53 = vector.load %arg3[%c64, %c0_18] : memref<384x384xbf16, #tpu.memory_space<vmem>>, vector<64x384xbf16>
      %cst_19 = arith.constant dense<0.000000e+00> : vector<16x384xf32>
      %54 = tpu.matmul %52, %53, %cst_19 {dimension_numbers = #tpu.dot_dimension_numbers<[1], [0], [0], [1], [0, 0, 1, 1], [], []>} : vector<16x64xbf16>, vector<64x384xbf16>, vector<16x384xf32> -> vector<16x384xf32>
      %55 = arith.addf %33, %54 : vector<16x384xf32>
      %56 = vector.extract_strided_slice %10 {offsets = [0, 128], sizes = [16, 64], strides = [1, 1]} : vector<16x1152xbf16> to vector<16x64xbf16>
      %57 = vector.extract_strided_slice %10 {offsets = [0, 512], sizes = [16, 64], strides = [1, 1]} : vector<16x1152xbf16> to vector<16x64xbf16>
      %58 = vector.extract_strided_slice %10 {offsets = [0, 896], sizes = [16, 64], strides = [1, 1]} : vector<16x1152xbf16> to vector<16x64xbf16>
      %cst_20 = arith.constant dense<0.000000e+00> : vector<16x16xf32>
      %59 = tpu.matmul %56, %57, %cst_20 {dimension_numbers = #tpu.dot_dimension_numbers<[1], [1], [0], [0], [0, 0, 1, 0], [], []>} : vector<16x64xbf16>, vector<16x64xbf16>, vector<16x16xf32> -> vector<16x16xf32>
      %cst_21 = arith.constant 0xFF800000 : f32
      %60 = vector.broadcast %cst_21 : f32 to vector<16x16xf32>
      %61 = arith.select %2, %59, %60 : vector<16x16xi1>, vector<16x16xf32>
      %cst_22 = arith.constant dense<0xFF800000> : vector<16xf32>
      %62 = vector.multi_reduction <maximumf>, %61, %cst_22 [1] : vector<16x16xf32> to vector<16xf32>
      %63 = vector.shape_cast %62 : vector<16xf32> to vector<16x1xf32>
      %64 = vector.broadcast %63 : vector<16x1xf32> to vector<16x16xf32>
      %65 = arith.subf %61, %64 : vector<16x16xf32>
      %66 = math.exp %65 : vector<16x16xf32>
      %cst_23 = arith.constant dense<0.000000e+00> : vector<16xf32>
      %67 = vector.multi_reduction <add>, %66, %cst_23 [1] : vector<16x16xf32> to vector<16xf32>
      %68 = vector.shape_cast %67 : vector<16xf32> to vector<16x1xf32>
      %69 = tpu.reciprocal %68 {approx = true} : vector<16x1xf32> -> vector<16x1xf32>
      %70 = vector.broadcast %69 : vector<16x1xf32> to vector<16x16xf32>
      %71 = arith.mulf %66, %70 : vector<16x16xf32>
      %72 = arith.truncf %71 : vector<16x16xf32> to vector<16x16xbf16>
      %cst_24 = arith.constant dense<0.000000e+00> : vector<16x64xf32>
      %73 = tpu.matmul %72, %58, %cst_24 {dimension_numbers = #tpu.dot_dimension_numbers<[1], [0], [0], [1], [0, 0, 1, 1], [], []>} : vector<16x16xbf16>, vector<16x64xbf16>, vector<16x64xf32> -> vector<16x64xf32>
      %74 = arith.truncf %73 : vector<16x64xf32> to vector<16x64xbf16>
      %c128 = arith.constant 128 : index
      %c0_25 = arith.constant 0 : index
      %75 = vector.load %arg3[%c128, %c0_25] : memref<384x384xbf16, #tpu.memory_space<vmem>>, vector<64x384xbf16>
      %cst_26 = arith.constant dense<0.000000e+00> : vector<16x384xf32>
      %76 = tpu.matmul %74, %75, %cst_26 {dimension_numbers = #tpu.dot_dimension_numbers<[1], [0], [0], [1], [0, 0, 1, 1], [], []>} : vector<16x64xbf16>, vector<64x384xbf16>, vector<16x384xf32> -> vector<16x384xf32>
      %77 = arith.addf %55, %76 : vector<16x384xf32>
      %78 = vector.extract_strided_slice %10 {offsets = [0, 192], sizes = [16, 64], strides = [1, 1]} : vector<16x1152xbf16> to vector<16x64xbf16>
      %79 = vector.extract_strided_slice %10 {offsets = [0, 576], sizes = [16, 64], strides = [1, 1]} : vector<16x1152xbf16> to vector<16x64xbf16>
      %80 = vector.extract_strided_slice %10 {offsets = [0, 960], sizes = [16, 64], strides = [1, 1]} : vector<16x1152xbf16> to vector<16x64xbf16>
      %cst_27 = arith.constant dense<0.000000e+00> : vector<16x16xf32>
      %81 = tpu.matmul %78, %79, %cst_27 {dimension_numbers = #tpu.dot_dimension_numbers<[1], [1], [0], [0], [0, 0, 1, 0], [], []>} : vector<16x64xbf16>, vector<16x64xbf16>, vector<16x16xf32> -> vector<16x16xf32>
      %cst_28 = arith.constant 0xFF800000 : f32
      %82 = vector.broadcast %cst_28 : f32 to vector<16x16xf32>
      %83 = arith.select %2, %81, %82 : vector<16x16xi1>, vector<16x16xf32>
      %cst_29 = arith.constant dense<0xFF800000> : vector<16xf32>
      %84 = vector.multi_reduction <maximumf>, %83, %cst_29 [1] : vector<16x16xf32> to vector<16xf32>
      %85 = vector.shape_cast %84 : vector<16xf32> to vector<16x1xf32>
      %86 = vector.broadcast %85 : vector<16x1xf32> to vector<16x16xf32>
      %87 = arith.subf %83, %86 : vector<16x16xf32>
      %88 = math.exp %87 : vector<16x16xf32>
      %cst_30 = arith.constant dense<0.000000e+00> : vector<16xf32>
      %89 = vector.multi_reduction <add>, %88, %cst_30 [1] : vector<16x16xf32> to vector<16xf32>
      %90 = vector.shape_cast %89 : vector<16xf32> to vector<16x1xf32>
      %91 = tpu.reciprocal %90 {approx = true} : vector<16x1xf32> -> vector<16x1xf32>
      %92 = vector.broadcast %91 : vector<16x1xf32> to vector<16x16xf32>
      %93 = arith.mulf %88, %92 : vector<16x16xf32>
      %94 = arith.truncf %93 : vector<16x16xf32> to vector<16x16xbf16>
      %cst_31 = arith.constant dense<0.000000e+00> : vector<16x64xf32>
      %95 = tpu.matmul %94, %80, %cst_31 {dimension_numbers = #tpu.dot_dimension_numbers<[1], [0], [0], [1], [0, 0, 1, 1], [], []>} : vector<16x16xbf16>, vector<16x64xbf16>, vector<16x64xf32> -> vector<16x64xf32>
      %96 = arith.truncf %95 : vector<16x64xf32> to vector<16x64xbf16>
      %c192 = arith.constant 192 : index
      %c0_32 = arith.constant 0 : index
      %97 = vector.load %arg3[%c192, %c0_32] : memref<384x384xbf16, #tpu.memory_space<vmem>>, vector<64x384xbf16>
      %cst_33 = arith.constant dense<0.000000e+00> : vector<16x384xf32>
      %98 = tpu.matmul %96, %97, %cst_33 {dimension_numbers = #tpu.dot_dimension_numbers<[1], [0], [0], [1], [0, 0, 1, 1], [], []>} : vector<16x64xbf16>, vector<64x384xbf16>, vector<16x384xf32> -> vector<16x384xf32>
      %99 = arith.addf %77, %98 : vector<16x384xf32>
      %100 = vector.extract_strided_slice %10 {offsets = [0, 256], sizes = [16, 64], strides = [1, 1]} : vector<16x1152xbf16> to vector<16x64xbf16>
      %101 = vector.extract_strided_slice %10 {offsets = [0, 640], sizes = [16, 64], strides = [1, 1]} : vector<16x1152xbf16> to vector<16x64xbf16>
      %102 = vector.extract_strided_slice %10 {offsets = [0, 1024], sizes = [16, 64], strides = [1, 1]} : vector<16x1152xbf16> to vector<16x64xbf16>
      %cst_34 = arith.constant dense<0.000000e+00> : vector<16x16xf32>
      %103 = tpu.matmul %100, %101, %cst_34 {dimension_numbers = #tpu.dot_dimension_numbers<[1], [1], [0], [0], [0, 0, 1, 0], [], []>} : vector<16x64xbf16>, vector<16x64xbf16>, vector<16x16xf32> -> vector<16x16xf32>
      %cst_35 = arith.constant 0xFF800000 : f32
      %104 = vector.broadcast %cst_35 : f32 to vector<16x16xf32>
      %105 = arith.select %2, %103, %104 : vector<16x16xi1>, vector<16x16xf32>
      %cst_36 = arith.constant dense<0xFF800000> : vector<16xf32>
      %106 = vector.multi_reduction <maximumf>, %105, %cst_36 [1] : vector<16x16xf32> to vector<16xf32>
      %107 = vector.shape_cast %106 : vector<16xf32> to vector<16x1xf32>
      %108 = vector.broadcast %107 : vector<16x1xf32> to vector<16x16xf32>
      %109 = arith.subf %105, %108 : vector<16x16xf32>
      %110 = math.exp %109 : vector<16x16xf32>
      %cst_37 = arith.constant dense<0.000000e+00> : vector<16xf32>
      %111 = vector.multi_reduction <add>, %110, %cst_37 [1] : vector<16x16xf32> to vector<16xf32>
      %112 = vector.shape_cast %111 : vector<16xf32> to vector<16x1xf32>
      %113 = tpu.reciprocal %112 {approx = true} : vector<16x1xf32> -> vector<16x1xf32>
      %114 = vector.broadcast %113 : vector<16x1xf32> to vector<16x16xf32>
      %115 = arith.mulf %110, %114 : vector<16x16xf32>
      %116 = arith.truncf %115 : vector<16x16xf32> to vector<16x16xbf16>
      %cst_38 = arith.constant dense<0.000000e+00> : vector<16x64xf32>
      %117 = tpu.matmul %116, %102, %cst_38 {dimension_numbers = #tpu.dot_dimension_numbers<[1], [0], [0], [1], [0, 0, 1, 1], [], []>} : vector<16x16xbf16>, vector<16x64xbf16>, vector<16x64xf32> -> vector<16x64xf32>
      %118 = arith.truncf %117 : vector<16x64xf32> to vector<16x64xbf16>
      %c256 = arith.constant 256 : index
      %c0_39 = arith.constant 0 : index
      %119 = vector.load %arg3[%c256, %c0_39] : memref<384x384xbf16, #tpu.memory_space<vmem>>, vector<64x384xbf16>
      %cst_40 = arith.constant dense<0.000000e+00> : vector<16x384xf32>
      %120 = tpu.matmul %118, %119, %cst_40 {dimension_numbers = #tpu.dot_dimension_numbers<[1], [0], [0], [1], [0, 0, 1, 1], [], []>} : vector<16x64xbf16>, vector<64x384xbf16>, vector<16x384xf32> -> vector<16x384xf32>
      %121 = arith.addf %99, %120 : vector<16x384xf32>
      %122 = vector.extract_strided_slice %10 {offsets = [0, 320], sizes = [16, 64], strides = [1, 1]} : vector<16x1152xbf16> to vector<16x64xbf16>
      %123 = vector.extract_strided_slice %10 {offsets = [0, 704], sizes = [16, 64], strides = [1, 1]} : vector<16x1152xbf16> to vector<16x64xbf16>
      %124 = vector.extract_strided_slice %10 {offsets = [0, 1088], sizes = [16, 64], strides = [1, 1]} : vector<16x1152xbf16> to vector<16x64xbf16>
      %cst_41 = arith.constant dense<0.000000e+00> : vector<16x16xf32>
      %125 = tpu.matmul %122, %123, %cst_41 {dimension_numbers = #tpu.dot_dimension_numbers<[1], [1], [0], [0], [0, 0, 1, 0], [], []>} : vector<16x64xbf16>, vector<16x64xbf16>, vector<16x16xf32> -> vector<16x16xf32>
      %cst_42 = arith.constant 0xFF800000 : f32
      %126 = vector.broadcast %cst_42 : f32 to vector<16x16xf32>
      %127 = arith.select %2, %125, %126 : vector<16x16xi1>, vector<16x16xf32>
      %cst_43 = arith.constant dense<0xFF800000> : vector<16xf32>
      %128 = vector.multi_reduction <maximumf>, %127, %cst_43 [1] : vector<16x16xf32> to vector<16xf32>
      %129 = vector.shape_cast %128 : vector<16xf32> to vector<16x1xf32>
      %130 = vector.broadcast %129 : vector<16x1xf32> to vector<16x16xf32>
      %131 = arith.subf %127, %130 : vector<16x16xf32>
      %132 = math.exp %131 : vector<16x16xf32>
      %cst_44 = arith.constant dense<0.000000e+00> : vector<16xf32>
      %133 = vector.multi_reduction <add>, %132, %cst_44 [1] : vector<16x16xf32> to vector<16xf32>
      %134 = vector.shape_cast %133 : vector<16xf32> to vector<16x1xf32>
      %135 = tpu.reciprocal %134 {approx = true} : vector<16x1xf32> -> vector<16x1xf32>
      %136 = vector.broadcast %135 : vector<16x1xf32> to vector<16x16xf32>
      %137 = arith.mulf %132, %136 : vector<16x16xf32>
      %138 = arith.truncf %137 : vector<16x16xf32> to vector<16x16xbf16>
      %cst_45 = arith.constant dense<0.000000e+00> : vector<16x64xf32>
      %139 = tpu.matmul %138, %124, %cst_45 {dimension_numbers = #tpu.dot_dimension_numbers<[1], [0], [0], [1], [0, 0, 1, 1], [], []>} : vector<16x16xbf16>, vector<16x64xbf16>, vector<16x64xf32> -> vector<16x64xf32>
      %140 = arith.truncf %139 : vector<16x64xf32> to vector<16x64xbf16>
      %c320 = arith.constant 320 : index
      %c0_46 = arith.constant 0 : index
      %141 = vector.load %arg3[%c320, %c0_46] : memref<384x384xbf16, #tpu.memory_space<vmem>>, vector<64x384xbf16>
      %cst_47 = arith.constant dense<0.000000e+00> : vector<16x384xf32>
      %142 = tpu.matmul %140, %141, %cst_47 {dimension_numbers = #tpu.dot_dimension_numbers<[1], [0], [0], [1], [0, 0, 1, 1], [], []>} : vector<16x64xbf16>, vector<64x384xbf16>, vector<16x384xf32> -> vector<16x384xf32>
      %143 = arith.addf %121, %142 : vector<16x384xf32>
      %c0_48 = arith.constant 0 : index
      %c0_49 = arith.constant 0 : index
      %144 = vector.load %arg4[%c0_48, %c0_49] : memref<1x384xf32, #tpu.memory_space<vmem>>, vector<1x384xf32>
      %145 = vector.broadcast %144 : vector<1x384xf32> to vector<16x384xf32>
      %146 = arith.addf %143, %145 : vector<16x384xf32>
      %147 = arith.index_cast %arg6 : i32 to index
      %c0_50 = arith.constant 0 : index
      %c0_51 = arith.constant 0 : index
      %148 = vector.load %arg5[%147, %c0_50, %c0_51] : memref<2x16x384xf32, #tpu.memory_space<vmem>>, vector<1x16x384xf32>
      %149 = vector.shape_cast %148 : vector<1x16x384xf32> to vector<16x384xf32>
      %150 = vector.shape_cast %146 : vector<16x384xf32> to vector<1x16x384xf32>
      tpu.vector_store %arg5[%147, %c0_50, %c0_51], %150 {strides = array<i32>} : memref<2x16x384xf32, #tpu.memory_space<vmem>>, vector<1x16x384xf32>,
    }
    %c2_i32_0 = arith.constant 2 : i32
    return
  }
  func.func @transform_0(%arg0: i32) -> (i32, i32, i32) {
    %c0_i32 = arith.constant 0 : i32
    %c0_i32_0 = arith.constant 0 : i32
    %c0_i32_1 = arith.constant 0 : i32
    return %arg0, %c0_i32, %c0_i32_0 : i32, i32, i32
  }
  func.func @transform_1(%arg0: i32) -> (i32, i32) {
    %c0_i32 = arith.constant 0 : i32
    %c0_i32_0 = arith.constant 0 : i32
    %c0_i32_1 = arith.constant 0 : i32
    return %c0_i32, %c0_i32_0 : i32, i32
  }
  func.func @transform_2(%arg0: i32) -> (i32, i32) {
    %c0_i32 = arith.constant 0 : i32
    %c0_i32_0 = arith.constant 0 : i32
    %c0_i32_1 = arith.constant 0 : i32
    return %c0_i32, %c0_i32_0 : i32, i32
  }
  func.func @transform_3(%arg0: i32) -> (i32, i32) {
    %c0_i32 = arith.constant 0 : i32
    %c0_i32_0 = arith.constant 0 : i32
    %c0_i32_1 = arith.constant 0 : i32
    return %c0_i32, %c0_i32_0 : i32, i32
  }
  func.func @transform_4(%arg0: i32) -> (i32, i32, i32) {
    %c0_i32 = arith.constant 0 : i32
    %c0_i32_0 = arith.constant 0 : i32
    %c0_i32_1 = arith.constant 0 : i32
    return %arg0, %c0_i32, %c0_i32_0 : i32, i32, i32
  }
}

</mosaic_0001>

<bundles_post_ra>
// kernel: heads_forward_packed.1
= control target key start
LH: loop header
LB: loop body
LE: loop exit
PB: predicated region body
PF: predicated region fallthrough
CT: control target
= control target key end

     0   :  { %9 = vsyncpa [#allocation3], 0  ;;  %s5215_s0 = inlined_call_operand.hbm [shape: f32[2,16,384], index: 0, kind: input, shape index: {}]   ;;  %s5216_s1 = inlined_call_operand.hbm [shape: bf16[384,1152], index: 1, kind: input, shape index: {}]   ;;  %s5217_s2 = inlined_call_operand.hbm [shape: bf16[384,384], index: 2, kind: input, shape index: {}]   ;;  %s5218_s3 = inlined_call_operand.vmem [shape: f32[1,384], index: 3, kind: input, shape index: {}]   ;;  %s5219_s4 = inlined_call_operand.hbm [shape: f32[2,16,384], index: 4, kind: output, shape index: {}]  }
   0x1   :  { %10 = vsyncpa [#allocation6], 0 }
   0x2   :  { %11 = vsyncpa [#allocation4], 0  ;;  %s4819_s15 = smov [#allocation5]  }
   0x3   :  { %s29_s16 = sshll.u32 %s4819_s15, 4  ;;  %s30_s16 = int_to_ptr.vmem [resolvable:$true] %s29_s16 }
   0x4   :  { %s4733_s17 = scalar_lea.vmem %s30_s16, 27648  ;;  %p4738_p1 = scmp.lt.s32.totalorder %s30_s16, %s30_s16 }
   0x5   :  { %p4734_p0 = scmp.ne.s32.totalorder %s30_s16, %s4733_s17  ;;  %p4739_p2 = scmp.lt.s32.totalorder %s4733_s17, %s4733_s17 }
   0x7   :  { %p4740_p3 = por %p4739_p2, %p4738_p1 }
   0x9   :  { %p4741_p4 = pnand %p4740_p3, %p4734_p0 }
   0xb   :  { %4744 = shalt.err (!%p4741_p4)
}
   0xc   :  { %s4820_s18 = smov 576   ;;  %s4821_s19 = smov 36  }
   0xd   :  { %35 = dma.hbm_to_vmem [thread:$0]  %s5216_s1, 27648, %s30_s16, [#allocation6], %s4820_s18, %s4820_s18, %s4821_s19  }
   0xe   :  { %s4822_s22 = smov [#allocation2]  }
   0xf   :  { %s17_s23 = sshll.u32 %s4822_s22, 4  ;;  %s18_s23 = int_to_ptr.vmem [resolvable:$true] %s17_s23 }
  0x10   :  { %s4753_s24 = scalar_lea.vmem %s18_s23, 1536  ;;  %p4758_p6 = scmp.lt.s32.totalorder %s18_s23, %s18_s23 }
  0x11   :  { %p4754_p5 = scmp.ne.s32.totalorder %s18_s23, %s4753_s24  ;;  %p4759_p7 = scmp.lt.s32.totalorder %s4753_s24, %s4753_s24 }
  0x13   :  { %p4760_p8 = por %p4759_p7, %p4758_p6 }
  0x15   :  { %p4761_p9 = pnand %p4760_p8, %p4754_p5 }
  0x17   :  { %4764 = shalt.err (!%p4761_p9)
}
  0x18   :  { %s4823_s25 = smov 384   ;;  %s4824_s26 = smov 24  }
  0x19   :  { %23 = dma.hbm_to_vmem [thread:$0]  %s5215_s0, 1536, %s18_s23, [#allocation3], %s4823_s25, %s4823_s25, %s4824_s26  }
  0x1a   :  { %s4825_s1 = smov [#allocation7]  }
  0x1b   :  { %s41_s29 = sshll.u32 %s4825_s1, 4  ;;  %s42_s29 = int_to_ptr.vmem [resolvable:$true] %s41_s29 }
  0x1c   :  { %s4773_s30 = scalar_lea.vmem %s42_s29, 9216  ;;  %p4778_p11 = scmp.lt.s32.totalorder %s42_s29, %s42_s29 }
  0x1d   :  { %p4774_p10 = scmp.ne.s32.totalorder %s42_s29, %s4773_s30  ;;  %p4779_p12 = scmp.lt.s32.totalorder %s4773_s30, %s4773_s30 }
  0x1f   :  { %p4780_p13 = por %p4779_p12, %p4778_p11 }
  0x21   :  { %p4781_p0 = pnand %p4780_p13, %p4774_p10 }
  0x23   :  { %4784 = shalt.err (!%p4781_p0)
}
  0x24   :  { %s4826_s5 = smov 192   ;;  %s4827_s6 = smov 12  }
  0x25   :  { %47 = dma.hbm_to_vmem [thread:$0]  %s5217_s2, 9216, %s42_s29, [#allocation6], %s4826_s5, %s4826_s5, %s4827_s6  }
  0x26   :  { %4809 = dma.done.wait [#allocation3], 1536  }
  0x27   :  { %4810 = vsyncadd [#allocation3], 4294965760 }
  0x28   :  { %4811 = dma.done.wait [#allocation6], 36864  }
  0x29   :  { %4812 = vsyncadd [#allocation6], 4294930432  ;;  %v60_v0 = vlaneseq  ;;  %s4882_s0 = smov 0  }
  0x2b   :  { %v4870_v1 = vshrl.u32 %v60_v0, 7  ;;  %v64_v2 = vand.u32 127, %v60_v0 }
  0x2d   :  { %v62_v3 = vadd.s32 8, %v4870_v1  ;;  %vm4874_vm0 = vcmp.le.s32.totalorder %v64_v2, %v4870_v1 }
  0x2f   :  { %vm4878_vm1 = vcmp.le.s32.totalorder %v64_v2, %v62_v3 }
  0x30 LB: > { %v4269_v6 = vld [vmem:[#allocation5 + $0x1fc] ss:$36 sps:$4 sm:$0xff]   ;;  %v4828_v8 = vmov 0   ;;  %v4275_v11 = vld [vmem:[#allocation5 + $0x1b4] ss:$36 sps:$4 sm:$0xff]   ;;  %s3996_s2 = smul.u32 48, %s4817_s0  ;;  %s4817_s0 = sphi %s4882_s0, %s72_s0  }
  0x31   : > { %v4271_v7 = vld [vmem:[#allocation5 + $0x67c] ss:$36 sps:$4 sm:$0xff]   ;;  %1504 = vmatprep.mubr.bf16.mxu1 %v4828_v8  ;;  %1429 = vmatprep.subr.bf16.mxu0 %v4269_v6  ;;  %v4277_v12 = vld [vmem:[#allocation5 + $0x634] ss:$36 sps:$4 sm:$0xff]   ;;  %v4281_v15 = vld [vmem:[#allocation5 + $0x16c] ss:$36 sps:$4 sm:$0xff]  }
  0x32   : > { %v4273_v9 = vld [vmem:[#allocation5 + $0x1f8] ss:$36 sps:$4 sm:$0xff]   ;;  %1472 = vmatprep.subr.bf16.mxu1 %v4271_v7  ;;  %v4279_v13 = vld [vmem:[#allocation5 + $0x1b0] ss:$36 sps:$4 sm:$0xff]   ;;  %v4285_v17 = vld [vmem:[#allocation5 + $0x168] ss:$36 sps:$4 sm:$0xff]  }
  0x33   : > { %v4274_v10 = vld [vmem:[#allocation5 + $0x678] ss:$36 sps:$4 sm:$0xff]   ;;  %1430 = vmatpush1.bf16.msra.mxu0 %v4273_v9  ;;  %v4280_v14 = vld [vmem:[#allocation5 + $0x630] ss:$36 sps:$4 sm:$0xff]   ;;  %v4286_v18 = vld [vmem:[#allocation5 + $0x5e8] ss:$36 sps:$4 sm:$0xff]  }
  0x34   : > { %1473 = vmatpush1.bf16.msra.mxu1 %v4274_v10  ;;  %1431 = vmatprep.subr.bf16.mxu0 %v4275_v11  ;;  %v4283_v16 = vld [vmem:[#allocation5 + $0x5ec] ss:$36 sps:$4 sm:$0xff]   ;;  %v4287_v19 = vld [vmem:[#allocation5 + $0x124] ss:$36 sps:$4 sm:$0xff]   ;;  %v4293_v23 = vld [vmem:[#allocation5 + $0xdc] ss:$36 sps:$4 sm:$0xff]  }
  0x35   : > { %1474 = vmatprep.subr.bf16.mxu1 %v4277_v12  ;;  %v4289_v20 = vld [vmem:[#allocation5 + $0x5a4] ss:$36 sps:$4 sm:$0xff]   ;;  %v4295_v24 = vld [vmem:[#allocation5 + $0x55c] ss:$36 sps:$4 sm:$0xff]   ;;  %v4299_v27 = vld [vmem:[#allocation5 + $0x94] ss:$36 sps:$4 sm:$0xff]  }
  0x36   : > { %v4291_v21 = vld [vmem:[#allocation5 + $0x120] ss:$36 sps:$4 sm:$0xff]   ;;  %v4297_v25 = vld [vmem:[#allocation5 + $0xd8] ss:$36 sps:$4 sm:$0xff]   ;;  %v4303_v29 = vld [vmem:[#allocation5 + $0x90] ss:$36 sps:$4 sm:$0xff]  }
  0x37   : > { %1432 = vmatpush1.bf16.msra.mxu0 %v4279_v13  ;;  %v4292_v22 = vld [vmem:[#allocation5 + $0x5a0] ss:$36 sps:$4 sm:$0xff]   ;;  %v4298_v26 = vld [vmem:[#allocation5 + $0x558] ss:$36 sps:$4 sm:$0xff]   ;;  %v4304_v30 = vld [vmem:[#allocation5 + $0x510] ss:$36 sps:$4 sm:$0xff]  }
  0x38   : > { %1475 = vmatpush1.bf16.msra.mxu1 %v4280_v14  ;;  %1433 = vmatprep.subr.bf16.mxu0 %v4281_v15  ;;  %v4301_v28 = vld [vmem:[#allocation5 + $0x514] ss:$36 sps:$4 sm:$0xff]   ;;  %v4305_v31 = vld [vmem:[#allocation5 + $0x4c] ss:$36 sps:$4 sm:$0xff]   ;;  %v4311_v35 = vld [vmem:[#allocation5 + $0x4] ss:$36 sps:$4 sm:$0xff]  }
  0x39   : > { %1476 = vmatprep.subr.bf16.mxu1 %v4283_v16  ;;  %v4307_v32 = vld [vmem:[#allocation5 + $0x4cc] ss:$36 sps:$4 sm:$0xff]   ;;  %v4313_v36 = vld [vmem:[#allocation5 + $0x484] ss:$36 sps:$4 sm:$0xff]   ;;  %s4891_s9 = scalar_lea.vmem [#allocation2], %s3996_s2  ;;  %vm4830_vm2 = vmmov 0  }
  0x3a   : > { %v4309_v33 = vld [vmem:[#allocation5 + $0x48] ss:$36 sps:$4 sm:$0xff]   ;;  %v4315_v37 = vld [vmem:[#allocation5] ss:$36 sps:$4 sm:$0xff]   ;;  %v78_v39 = vld [vmem:[%s4891_s9 + $0x10] sm:$0xff]  ;;  %vm1864_vm3 = vcmask 523264  }
  0x3b   : > { %1434 = vmatpush1.bf16.msra.mxu0 %v4285_v17  ;;  %v4310_v34 = vld [vmem:[#allocation5 + $0x4c8] ss:$36 sps:$4 sm:$0xff]   ;;  %v4316_v38 = vld [vmem:[#allocation5 + $0x480] ss:$36 sps:$4 sm:$0xff]   ;;  %v4322_v45 = vld [vmem:[#allocation5 + $0x438] ss:$36 sps:$4 sm:$0xff]  }
  0x3c   : > { %1477 = vmatpush1.bf16.msra.mxu1 %v4286_v18  ;;  %1435 = vmatprep.subr.bf16.mxu0 %v4287_v19  ;;  %v81_v40 = vld [vmem:[%s4891_s9 + $0x28] sm:$0xff]  ;;  %v4317_v41 = vld [vmem:[#allocation5 + $0x43c] ss:$36 sps:$4 sm:$0xff]   ;;  %v4323_v46 = vld [vmem:[#allocation5 + $0x3f4] ss:$36 sps:$4 sm:$0xff]   ;;  %s4831_s10 = smov 64  }
  0x3d   : > { %1478 = vmatprep.subr.bf16.mxu1 %v4289_v20  ;;  %v4321_v42 = vld [vmem:[#allocation5 + $0x204] ss:$36 sps:$4 sm:$0xff]   ;;  %v4895_v43 = vpack.c.bf16 %v81_v40, %v78_v39  ;;  %v4327_v47 = vld [vmem:[#allocation5 + $0x1bc] ss:$36 sps:$4 sm:$0xff]   ;;  %v4328_v49 = vld [vmem:[#allocation5 + $0x3f0] ss:$36 sps:$4 sm:$0xff]  }
  0x3e   : > { %v4319_v44 = vld [vmem:[#allocation5 + $0x200] ss:$36 sps:$4 sm:$0xff]   ;;  %v4325_v48 = vld [vmem:[#allocation5 + $0x1b8] ss:$36 sps:$4 sm:$0xff]   ;;  %v4329_v50 = vld [vmem:[#allocation5 + $0x3ac] ss:$36 sps:$4 sm:$0xff]  }
  0x3f   : > { %1436 = vmatpush1.bf16.msra.mxu0 %v4291_v21  ;;  %v4333_v51 = vld [vmem:[#allocation5 + $0x174] ss:$36 sps:$4 sm:$0xff]   ;;  %v4334_v53 = vld [vmem:[#allocation5 + $0x3a8] ss:$36 sps:$4 sm:$0xff]   ;;  %v80_v57 = vld [vmem:[%s4891_s9 + $0x20] sm:$0xff]  ;;  %vm1914_vm4 = vcmask 130048  }
  0x40   : > { %1479 = vmatpush1.bf16.msra.mxu1 %v4292_v22  ;;  %1437 = vmatprep.subr.bf16.mxu0 %v4293_v23  ;;  %v4331_v52 = vld [vmem:[#allocation5 + $0x170] ss:$36 sps:$4 sm:$0xff]   ;;  %v4335_v54 = vld [vmem:[#allocation5 + $0x364] ss:$36 sps:$4 sm:$0xff]   ;;  %v4341_v61 = vld [vmem:[#allocation5 + $0x31c] ss:$36 sps:$4 sm:$0xff]  }
  0x41   : > { %1480 = vmatprep.subr.bf16.mxu1 %v4295_v24  ;;  %v4339_v55 = vld [vmem:[#allocation5 + $0x12c] ss:$36 sps:$4 sm:$0xff]   ;;  %v4340_v59 = vld [vmem:[#allocation5 + $0x360] ss:$36 sps:$4 sm:$0xff]   ;;  %v4346_v0 = vld [vmem:[#allocation5 + $0x318] ss:$36 sps:$4 sm:$0xff]  }
  0x42   : > { %v77_v56 = vld [vmem:[%s4891_s9 + $0x8] sm:$0xff]  ;;  %v4343_v63 = vld [vmem:[#allocation5 + $0xe0] ss:$36 sps:$4 sm:$0xff]   ;;  %v4347_v2 = vld [vmem:[#allocation5 + $0x2d4] ss:$36 sps:$4 sm:$0xff]   ;;  %s3648_s13 = scalar_lea.vmem [#allocation8], %s3996_s2 }
  0x43   : > { %1438 = vmatpush1.bf16.msra.mxu0 %v4297_v25  ;;  %v4337_v58 = vld [vmem:[#allocation5 + $0x128] ss:$36 sps:$4 sm:$0xff]   ;;  %v4900_v60 = vpack.c.bf16 %v80_v57, %v77_v56  ;;  %v4351_v3 = vld [vmem:[#allocation5 + $0x9c] ss:$36 sps:$4 sm:$0xff]   ;;  %v4352_v7 = vld [vmem:[#allocation5 + $0x2d0] ss:$36 sps:$4 sm:$0xff]  }
  0x44   : > { %1481 = vmatpush1.bf16.msra.mxu1 %v4298_v26  ;;  %1439 = vmatprep.subr.bf16.mxu0 %v4299_v27  ;;  %v4345_v62 = vld [vmem:[#allocation5 + $0xe4] ss:$36 sps:$4 sm:$0xff]   ;;  %v4349_v6 = vld [vmem:[#allocation5 + $0x98] ss:$36 sps:$4 sm:$0xff]   ;;  %v4353_v9 = vld [vmem:[#allocation5 + $0x28c] ss:$36 sps:$4 sm:$0xff]  }
  0x45   : > { %1482 = vmatprep.subr.bf16.mxu1 %v4301_v28  ;;  %1461 = vmatprep.mubr.bf16.mxu0 %v4900_v60  ;;  %v4357_v10 = vld [vmem:[#allocation5 + $0x54] ss:$36 sps:$4 sm:$0xff]   ;;  %v4358_v12 = vld [vmem:[#allocation5 + $0x288] ss:$36 sps:$4 sm:$0xff]   ;;  %v4364_v16 = vld [vmem:[#allocation5 + $0x240] ss:$36 sps:$4 sm:$0xff]  }
  0x46   : > { %v4355_v11 = vld [vmem:[#allocation5 + $0x50] ss:$36 sps:$4 sm:$0xff]   ;;  %v4359_v13 = vld [vmem:[#allocation5 + $0x244] ss:$36 sps:$4 sm:$0xff]   ;;  %v79_v18 = vld [vmem:[%s4891_s9 + $0x18] sm:$0xff]  ;;  %s72_s0 = sadd.s32 1, %s4817_s0  }
  0x47   : > { %1440 = vmatpush1.bf16.msra.mxu0 %v4303_v29  ;;  %v4363_v14 = vld [vmem:[#allocation5 + $0xc] ss:$36 sps:$4 sm:$0xff]   ;;  %v76_v17 = vld [vmem:[%s4891_s9] sm:$0xff]  ;;  %v4371_v26 = vld [vmem:[#allocation5 + $0x3f8] ss:$36 sps:$4 sm:$0xff]   ;;  %p69_p1 = scmp.ge.s32.totalorder %s72_s0, 2  }
  0x48   : > { %1483 = vmatpush1.bf16.msra.mxu1 %v4304_v30  ;;  %1441 = vmatprep.subr.bf16.mxu0 %v4305_v31  ;;  %v4361_v15 = vld [vmem:[#allocation5 + $0x8] ss:$36 sps:$4 sm:$0xff]   ;;  %v4906_v21 = vpack.c.bf16 %v79_v18, %v76_v17  ;;  %v4365_v22 = vld [vmem:[#allocation5 + $0x440] ss:$36 sps:$4 sm:$0xff]   ;;  %v4374_v27 = vld [vmem:[#allocation5 + $0x638] ss:$36 sps:$4 sm:$0xff]  }
  0x49   : > { %1484 = vmatprep.subr.bf16.mxu1 %v4307_v32  ;;  %v4367_v19 = vld [vmem:[#allocation5 + $0x444] ss:$36 sps:$4 sm:$0xff]   ;;  %v4373_v24 = vld [vmem:[#allocation5 + $0x3fc] ss:$36 sps:$4 sm:$0xff]   ;;  %v4379_v28 = vld [vmem:[#allocation5 + $0x3b4] ss:$36 sps:$4 sm:$0xff]  }
  0x4a   : > { %v4370_v20 = vld [vmem:[#allocation5 + $0x684] ss:$36 sps:$4 sm:$0xff]   ;;  %v4376_v25 = vld [vmem:[#allocation5 + $0x63c] ss:$36 sps:$4 sm:$0xff]   ;;  %v4382_v29 = vld [vmem:[#allocation5 + $0x5f4] ss:$36 sps:$4 sm:$0xff]  }
  0x4b   : > { %1442 = vmatpush1.bf16.msra.mxu0 %v4309_v33  ;;  %v4368_v23 = vld [vmem:[#allocation5 + $0x680] ss:$36 sps:$4 sm:$0xff]   ;;  %v4377_v30 = vld [vmem:[#allocation5 + $0x3b0] ss:$36 sps:$4 sm:$0xff]   ;;  %s4832_s14 = smov (%p69_p1), [#allocation8]  }
  0x4c   : > { %1485 = vmatpush1.bf16.msra.mxu1 %v4310_v34  ;;  %1443 = vmatprep.subr.bf16.mxu0 %v4311_v35  ;;  %v4380_v31 = vld [vmem:[#allocation5 + $0x5f0] ss:$36 sps:$4 sm:$0xff]   ;;  %v4383_v34 = vld [vmem:[#allocation5 + $0x368] ss:$36 sps:$4 sm:$0xff]   ;;  %v4392_v39 = vld [vmem:[#allocation5 + $0x560] ss:$36 sps:$4 sm:$0xff]  }
  0x4d   : > { %1486 = vmatprep.subr.bf16.mxu1 %v4313_v36  ;;  %v4385_v32 = vld [vmem:[#allocation5 + $0x36c] ss:$36 sps:$4 sm:$0xff]   ;;  %v4391_v36 = vld [vmem:[#allocation5 + $0x324] ss:$36 sps:$4 sm:$0xff]   ;;  %v4397_v40 = vld [vmem:[#allocation5 + $0x2dc] ss:$36 sps:$4 sm:$0xff]  }
  0x4e   : > { %v4388_v33 = vld [vmem:[#allocation5 + $0x5ac] ss:$36 sps:$4 sm:$0xff]   ;;  %v4416_v56 = vld [vmem:[#allocation5 + $0x1c0] ss:$36 sps:$4 sm:$0xff]   ;;  %s3660_s15 = sshll.u32 (%p69_p1), %s4832_s14, 4  ;;  %s3661_s15 = int_to_ptr.vmem [resolvable:$true] %s3660_s15 }
  0x4f   : > { %1444 = vmatpush1.bf16.msra.mxu0 %v4315_v37  ;;  %v4386_v35 = vld [vmem:[#allocation5 + $0x5a8] ss:$36 sps:$4 sm:$0xff]   ;;  %v4421_v57 = vld [vmem:[#allocation5 + $0x17c] ss:$36 sps:$4 sm:$0xff]   ;;  %v4446_v17 = vld [vmem:[#allocation5 + $0x370] ss:$36 sps:$4 sm:$0xff]   ;;  %p4790_p3 = scmp.lt.s32.totalorder (%p69_p1), %s3661_s15, %s3661_s15 }
  0x50   : > { %1487 = vmatpush1.bf16.msra.mxu1 %v4316_v38  ;;  %1445 = vmatprep.subr.bf16.mxu0 %v4317_v41  ;;  %v4394_v37 = vld [vmem:[#allocation5 + $0x564] ss:$36 sps:$4 sm:$0xff]   ;;  %v4400_v41 = vld [vmem:[#allocation5 + $0x51c] ss:$36 sps:$4 sm:$0xff]   ;;  %v4451_v18 = vld [vmem:[#allocation5 + $0x32c] ss:$36 sps:$4 sm:$0xff]  }
  0x51   : > { %1515 = vmatprep.subr.bf16.mxu1 %v4321_v42  ;;  %v4389_v38 = vld [vmem:[#allocation5 + $0x320] ss:$36 sps:$4 sm:$0xff]   ;;  %v4395_v42 = vld [vmem:[#allocation5 + $0x2d8] ss:$36 sps:$4 sm:$0xff]   ;;  %s4785_s16 = scalar_lea.vmem (%p69_p1), %s3661_s15, 1536 }
  0x52   :  { %p4786_p2 = scmp.ne.s32.totalorder (%p69_p1), %s3661_s15, %s4785_s16  ;;  %p4791_p4 = scmp.lt.s32.totalorder (%p69_p1), %s4785_s16, %s4785_s16 }
  0x53   : > { %1505 = vmatmul.mubr.bf16.vlgmr.msra.gmra.mxu1 %v4895_v43  ;;  %1446 = vmatpush2.bf16.msra.mxu0 %v4322_v45  ;;  %v4403_v45 = vld [vmem:[#allocation5 + $0x294] ss:$36 sps:$4 sm:$0xff]  }
  0x54   : > { %1516 = vmatpush1.bf16.msra.mxu1 %v4319_v44  ;;  %1447 = vmatprep.subr.bf16.mxu0 %v4323_v46  ;;  %v4398_v44 = vld [vmem:[#allocation5 + $0x518] ss:$36 sps:$4 sm:$0xff]   ;;  %p4792_p5 = por (%p69_p1), %p4791_p4, %p4790_p3 }
  0x55   : > { %1517 = vmatprep.subr.bf16.mxu1 %v4327_v47  ;;  %1547 = vmatprep.mubr.bf16.mxu1 %v4900_v60  ;;  %v4406_v46 = vld [vmem:[#allocation5 + $0x4d4] ss:$36 sps:$4 sm:$0xff]  }
  0x56   : > { %v4401_v47 = vld [vmem:[#allocation5 + $0x290] ss:$36 sps:$4 sm:$0xff]   ;;  %p4793_p6 = pnand (%p69_p1), %p4792_p5, %p4786_p2 }
  0x57   : > { %1448 = vmatpush2.bf16.msra.mxu0 %v4328_v49  ;;  %v4409_v49 = vld [vmem:[#allocation5 + $0x24c] ss:$36 sps:$4 sm:$0xff]  }
  0x58   : > { %1518 = vmatpush1.bf16.msra.mxu1 %v4325_v48  ;;  %1449 = vmatprep.subr.bf16.mxu0 %v4329_v50  ;;  %v4404_v48 = vld [vmem:[#allocation5 + $0x4d0] ss:$36 sps:$4 sm:$0xff]  }
  0x59   : > { %1519 = vmatprep.subr.bf16.mxu1 %v4333_v51  ;;  %v4412_v50 = vld [vmem:[#allocation5 + $0x48c] ss:$36 sps:$4 sm:$0xff]  }
  0x5a   : > { %v4407_v51 = vld [vmem:[#allocation5 + $0x248] ss:$36 sps:$4 sm:$0xff]  }
  0x5b   : > { %1450 = vmatpush2.bf16.msra.mxu0 %v4334_v53  ;;  %v4415_v53 = vld [vmem:[#allocation5 + $0x20c] ss:$36 sps:$4 sm:$0xff]  }
  0x5c   : > { %1520 = vmatpush1.bf16.msra.mxu1 %v4331_v52  ;;  %1451 = vmatprep.subr.bf16.mxu0 %v4335_v54  ;;  %v4410_v52 = vld [vmem:[#allocation5 + $0x488] ss:$36 sps:$4 sm:$0xff]  }
  0x5d   : > { %1521 = vmatprep.subr.bf16.mxu1 %v4339_v55  ;;  %v4413_v54 = vld [vmem:[#allocation5 + $0x208] ss:$36 sps:$4 sm:$0xff]  }
  0x5e   : > { %v4418_v55 = vld [vmem:[#allocation5 + $0x1c4] ss:$36 sps:$4 sm:$0xff]  }
  0x5f   : > { %1452 = vmatpush2.bf16.msra.mxu0 %v4340_v59  ;;  %v4424_v59 = vld [vmem:[#allocation5 + $0x134] ss:$36 sps:$4 sm:$0xff]  }
  0x60   : > { %1522 = vmatpush1.bf16.msra.mxu1 %v4337_v58  ;;  %1453 = vmatprep.subr.bf16.mxu0 %v4341_v61  ;;  %v4419_v58 = vld [vmem:[#allocation5 + $0x178] ss:$36 sps:$4 sm:$0xff]   ;;  %v4422_v61 = vld [vmem:[#allocation5 + $0x130] ss:$36 sps:$4 sm:$0xff]  }
  0x61   : > { %1523 = vmatprep.subr.bf16.mxu1 %v4345_v62  ;;  %v4427_v62 = vld [vmem:[#allocation5 + $0xec] ss:$36 sps:$4 sm:$0xff]  }
  0x63   : > { %1454 = vmatpush2.bf16.msra.mxu0 %v4346_v0  ;;  %v4430_v0 = vld [vmem:[#allocation5 + $0xa4] ss:$36 sps:$4 sm:$0xff]  }
  0x64   : > { %1524 = vmatpush1.bf16.msra.mxu1 %v4343_v63  ;;  %1455 = vmatprep.subr.bf16.mxu0 %v4347_v2  ;;  %v4425_v63 = vld [vmem:[#allocation5 + $0xe8] ss:$36 sps:$4 sm:$0xff]   ;;  %v4428_v2 = vld [vmem:[#allocation5 + $0xa0] ss:$36 sps:$4 sm:$0xff]  }
  0x65   : > { %1525 = vmatprep.subr.bf16.mxu1 %v4351_v3  ;;  %v4433_v3 = vld [vmem:[#allocation5 + $0x5c] ss:$36 sps:$4 sm:$0xff]  }
  0x67   : > { %1456 = vmatpush2.bf16.msra.mxu0 %v4352_v7  ;;  %v4436_v7 = vld [vmem:[#allocation5 + $0x14] ss:$36 sps:$4 sm:$0xff]  }
  0x68   : > { %1526 = vmatpush1.bf16.msra.mxu1 %v4349_v6  ;;  %1457 = vmatprep.subr.bf16.mxu0 %v4353_v9  ;;  %v4431_v6 = vld [vmem:[#allocation5 + $0x58] ss:$36 sps:$4 sm:$0xff]   ;;  %v4434_v9 = vld [vmem:[#allocation5 + $0x10] ss:$36 sps:$4 sm:$0xff]  }
  0x69   : > { %1527 = vmatprep.subr.bf16.mxu1 %v4357_v10  ;;  %v4439_v10 = vld [vmem:[#allocation5 + $0x44c] ss:$36 sps:$4 sm:$0xff]  }
  0x6b   : > { %1458 = vmatpush2.bf16.msra.mxu0 %v4358_v12  ;;  %v4442_v12 = vld [vmem:[#allocation5 + $0x404] ss:$36 sps:$4 sm:$0xff]  }
  0x6c   : > { %1528 = vmatpush1.bf16.msra.mxu1 %v4355_v11  ;;  %1459 = vmatprep.subr.bf16.mxu0 %v4359_v13  ;;  %v4437_v11 = vld [vmem:[#allocation5 + $0x448] ss:$36 sps:$4 sm:$0xff]   ;;  %v4440_v13 = vld [vmem:[#allocation5 + $0x400] ss:$36 sps:$4 sm:$0xff]  }
  0x6d   : > { %1529 = vmatprep.subr.bf16.mxu1 %v4363_v14  ;;  %v4445_v14 = vld [vmem:[#allocation5 + $0x3bc] ss:$36 sps:$4 sm:$0xff]  }
  0x6f   : > { %1460 = vmatpush2.bf16.msra.mxu0 %v4364_v16  ;;  %v4448_v16 = vld [vmem:[#allocation5 + $0x374] ss:$36 sps:$4 sm:$0xff]  }
  0x70   : > { %1530 = vmatpush1.bf16.msra.mxu1 %v4361_v15  ;;  %1558 = vmatprep.subr.bf16.mxu0 %v4370_v20  ;;  %v4443_v15 = vld [vmem:[#allocation5 + $0x3b8] ss:$36 sps:$4 sm:$0xff]   ;;  %v4491_v20 = vld [vmem:[#allocation5 + $0x68c] ss:$36 sps:$4 sm:$0xff]  }
  0x71   : > { %1531 = vmatprep.subr.bf16.mxu1 %v4367_v19  ;;  %v4489_v19 = vld [vmem:[#allocation5 + $0x688] ss:$36 sps:$4 sm:$0xff]  }
  0x72   : > { %1462 = vmatmul.mubr.bf16.vlgmr.msra.gmra.mxu0 %v4906_v21 }
  0x73   : > { %1559 = vmatpush1.bf16.msra.mxu0 %v4368_v23  ;;  %1590 = vmatprep.mubr.bf16.mxu0 %v4828_v8  ;;  %v4449_v23 = vld [vmem:[#allocation5 + $0x328] ss:$36 sps:$4 sm:$0xff]  }
  0x74   : > { %1532 = vmatpush2.bf16.msra.mxu1 %v4365_v22  ;;  %1560 = vmatprep.subr.bf16.mxu0 %v4376_v25  ;;  %v4496_v22 = vld [vmem:[#allocation5 + $0x644] ss:$36 sps:$4 sm:$0xff]  }
  0x75   : > { %1533 = vmatprep.subr.bf16.mxu1 %v4373_v24  ;;  %v4494_v24 = vld [vmem:[#allocation5 + $0x640] ss:$36 sps:$4 sm:$0xff]  }
  0x76   : > { %v4454_v25 = vld [vmem:[#allocation5 + $0x2e4] ss:$36 sps:$4 sm:$0xff]  }
  0x77   : > { %1561 = vmatpush1.bf16.msra.mxu0 %v4374_v27  ;;  %v4452_v27 = vld [vmem:[#allocation5 + $0x2e0] ss:$36 sps:$4 sm:$0xff]  }
  0x78   : > { %1534 = vmatpush2.bf16.msra.mxu1 %v4371_v26  ;;  %1562 = vmatprep.subr.bf16.mxu0 %v4382_v29  ;;  %v4501_v26 = vld [vmem:[#allocation5 + $0x5fc] ss:$36 sps:$4 sm:$0xff]  }
  0x79   : > { %1535 = vmatprep.subr.bf16.mxu1 %v4379_v28  ;;  %v4499_v28 = vld [vmem:[#allocation5 + $0x5f8] ss:$36 sps:$4 sm:$0xff]  }
  0x7a   : > { %v4457_v29 = vld [vmem:[#allocation5 + $0x29c] ss:$36 sps:$4 sm:$0xff]  }
  0x7b   : > { %1563 = vmatpush1.bf16.msra.mxu0 %v4380_v31  ;;  %v4455_v31 = vld [vmem:[#allocation5 + $0x298] ss:$36 sps:$4 sm:$0xff]  }
  0x7c   : > { %1536 = vmatpush2.bf16.msra.mxu1 %v4377_v30  ;;  %1564 = vmatprep.subr.bf16.mxu0 %v4388_v33  ;;  %v4506_v30 = vld [vmem:[#allocation5 + $0x5b4] ss:$36 sps:$4 sm:$0xff]  }
  0x7d   : > { %1537 = vmatprep.subr.bf16.mxu1 %v4385_v32  ;;  %v4504_v32 = vld [vmem:[#allocation5 + $0x5b0] ss:$36 sps:$4 sm:$0xff]  }
  0x7e   : > { %v4460_v33 = vld [vmem:[#allocation5 + $0x254] ss:$36 sps:$4 sm:$0xff]  }
  0x7f   : > { %1565 = vmatpush1.bf16.msra.mxu0 %v4386_v35  ;;  %v4463_v35 = vld [vmem:[#allocation5 + $0x694] ss:$36 sps:$4 sm:$0xff]  }
  0x80   : > { %1538 = vmatpush2.bf16.msra.mxu1 %v4383_v34  ;;  %1566 = vmatprep.subr.bf16.mxu0 %v4394_v37  ;;  %v4458_v34 = vld [vmem:[#allocation5 + $0x250] ss:$36 sps:$4 sm:$0xff]  }
  0x81   : > { %1539 = vmatprep.subr.bf16.mxu1 %v4391_v36  ;;  %v4461_v36 = vld [vmem:[#allocation5 + $0x690] ss:$36 sps:$4 sm:$0xff]  }
  0x82   : > { %v4466_v37 = vld [vmem:[#allocation5 + $0x64c] ss:$36 sps:$4 sm:$0xff]  }
  0x83   : > { %1567 = vmatpush1.bf16.msra.mxu0 %v4392_v39  ;;  %v4509_v39 = vld [vmem:[#allocation5 + $0x568] ss:$36 sps:$4 sm:$0xff]  }
  0x84   : > { %1540 = vmatpush2.bf16.msra.mxu1 %v4389_v38  ;;  %1568 = vmatprep.subr.bf16.mxu0 %v4400_v41  ;;  %v4511_v38 = vld [vmem:[#allocation5 + $0x56c] ss:$36 sps:$4 sm:$0xff]   ;;  %v4469_v41 = vld [vmem:[#allocation5 + $0x604] ss:$36 sps:$4 sm:$0xff]  }
  0x85   : > { %1541 = vmatprep.subr.bf16.mxu1 %v4397_v40  ;;  %v4464_v40 = vld [vmem:[#allocation5 + $0x648] ss:$36 sps:$4 sm:$0xff]  }
  0x87   : > { %1569 = vmatpush1.bf16.msra.mxu0 %v4398_v44  ;;  %v4514_v44 = vld [vmem:[#allocation5 + $0x520] ss:$36 sps:$4 sm:$0xff]  }
  0x88   : > { %1542 = vmatpush2.bf16.msra.mxu1 %v4395_v42  ;;  %1570 = vmatprep.subr.bf16.mxu0 %v4406_v46  ;;  %v4516_v42 = vld [vmem:[#allocation5 + $0x524] ss:$36 sps:$4 sm:$0xff]   ;;  %v4472_v46 = vld [vmem:[#allocation5 + $0x5bc] ss:$36 sps:$4 sm:$0xff]  }
  0x89   : > { %1543 = vmatprep.subr.bf16.mxu1 %v4403_v45  ;;  %v4467_v45 = vld [vmem:[#allocation5 + $0x600] ss:$36 sps:$4 sm:$0xff]  }
  0x8b   : > { %1571 = vmatpush1.bf16.msra.mxu0 %v4404_v48  ;;  %v4521_v48 = vld [vmem:[#allocation5 + $0x4dc] ss:$36 sps:$4 sm:$0xff]  }
  0x8c   : > { %1544 = vmatpush2.bf16.msra.mxu1 %v4401_v47  ;;  %1572 = vmatprep.subr.bf16.mxu0 %v4412_v50  ;;  %v4519_v47 = vld [vmem:[#allocation5 + $0x4d8] ss:$36 sps:$4 sm:$0xff]  }
  0x8d   : > { %1545 = vmatprep.subr.bf16.mxu1 %v4409_v49  ;;  %v4470_v49 = vld [vmem:[#allocation5 + $0x5b8] ss:$36 sps:$4 sm:$0xff]  }
  0x8e   : > { %v4475_v50 = vld [vmem:[#allocation5 + $0x574] ss:$36 sps:$4 sm:$0xff]  }
  0x8f   : > { %1573 = vmatpush1.bf16.msra.mxu0 %v4410_v52  ;;  %v4522_v52 = vld [vmem:[#allocation5 + $0x490] ss:$36 sps:$4 sm:$0xff]  }
  0x90   : > { %1546 = vmatpush2.bf16.msra.mxu1 %v4407_v51  ;;  %1601 = vmatprep.subr.bf16.mxu0 %v4415_v53  ;;  %v4524_v51 = vld [vmem:[#allocation5 + $0x494] ss:$36 sps:$4 sm:$0xff]  }
  0x91   : > { %1644 = vmatprep.subr.bf16.mxu1 %v4491_v20  ;;  %v4473_v53 = vld [vmem:[#allocation5 + $0x570] ss:$36 sps:$4 sm:$0xff]   ;;  %v4497_v20 = vld [vmem:[#allocation5 + $0x380] ss:$36 sps:$4 sm:$0xff]  }
  0x92   : > { %1591 = vmatmul.mubr.bf16.vlgmr.msra.gmra.mxu0 %v4895_v43 }
  0x93   : > { %1548 = vmatmul.mubr.bf16.vlgmr.msra.gmra.mxu1 %v4906_v21  ;;  %1602 = vmatpush1.bf16.msra.mxu0 %v4413_v54  ;;  %v4478_v54 = vld [vmem:[#allocation5 + $0x52c] ss:$36 sps:$4 sm:$0xff]  }
  0x94   : > { %1633 = vmatprep.mubr.bf16.mxu0 %v4900_v60  ;;  %1603 = vmatprep.subr.bf16.mxu0 %v4418_v55  ;;  %v4525_v55 = vld [vmem:[#allocation5 + $0x210] ss:$36 sps:$4 sm:$0xff]  }
  0x95   : > { %1676 = vmatprep.mubr.bf16.mxu1 %v4828_v8  ;;  %1645 = vmatpush1.bf16.msra.mxu1 %v4489_v19  ;;  %v4493_v19 = vld [vmem:[#allocation5 + $0x188] ss:$36 sps:$4 sm:$0xff]  }
  0x96   : > { %1646 = vmatprep.subr.bf16.mxu1 %v4496_v22  ;;  %v4543_v22 = vld [vmem:[#allocation5 + $0x60] ss:$36 sps:$4 sm:$0xff]  }
  0x97   : > { %1604 = vmatpush1.bf16.msra.mxu0 %v4416_v56  ;;  %v4527_v56 = vld [vmem:[#allocation5 + $0x214] ss:$36 sps:$4 sm:$0xff]  }
  0x98   : > { %1605 = vmatprep.subr.bf16.mxu0 %v4421_v57  ;;  %v4476_v57 = vld [vmem:[#allocation5 + $0x528] ss:$36 sps:$4 sm:$0xff]  }
  0x99   : > { %1647 = vmatpush1.bf16.msra.mxu1 %v4494_v24  ;;  %v4498_v24 = vld [vmem:[#allocation5 + $0x140] ss:$36 sps:$4 sm:$0xff]  }
  0x9a   : > { %1648 = vmatprep.subr.bf16.mxu1 %v4501_v26  ;;  %v4551_v26 = vld [vmem:[#allocation5 + $0x454] ss:$36 sps:$4 sm:$0xff]  }
  0x9b   : > { %1606 = vmatpush1.bf16.msra.mxu0 %v4419_v58  ;;  %v4481_v58 = vld [vmem:[#allocation5 + $0x4e4] ss:$36 sps:$4 sm:$0xff]  }
  0x9c   : > { %1607 = vmatprep.subr.bf16.mxu0 %v4424_v59  ;;  %v4528_v59 = vld [vmem:[#allocation5 + $0x1c8] ss:$36 sps:$4 sm:$0xff]  }
  0x9d   : > { %1649 = vmatpush1.bf16.msra.mxu1 %v4499_v28  ;;  %v4507_v28 = vld [vmem:[#allocation5 + $0x2f0] ss:$36 sps:$4 sm:$0xff]  }
  0x9e   : > { %1650 = vmatprep.subr.bf16.mxu1 %v4506_v30  ;;  %v4554_v30 = vld [vmem:[#allocation5 + $0x40c] ss:$36 sps:$4 sm:$0xff]  }
  0x9f   : > { %1608 = vmatpush1.bf16.msra.mxu0 %v4422_v61  ;;  %v4530_v61 = vld [vmem:[#allocation5 + $0x1cc] ss:$36 sps:$4 sm:$0xff]  }
  0xa0   : > { %1609 = vmatprep.subr.bf16.mxu0 %v4427_v62  ;;  %v4533_v62 = vld [vmem:[#allocation5 + $0x184] ss:$36 sps:$4 sm:$0xff]  }
  0xa1   : > { %1651 = vmatpush1.bf16.msra.mxu1 %v4504_v32  ;;  %v4512_v32 = vld [vmem:[#allocation5 + $0x2a8] ss:$36 sps:$4 sm:$0xff]  }
  0xa2   : > { %1652 = vmatprep.subr.bf16.mxu1 %v4511_v38  ;;  %v4560_v38 = vld [vmem:[#allocation5 + $0x37c] ss:$36 sps:$4 sm:$0xff]  }
  0xa3   : > { %1610 = vmatpush1.bf16.msra.mxu0 %v4425_v63  ;;  %v4479_v63 = vld [vmem:[#allocation5 + $0x4e0] ss:$36 sps:$4 sm:$0xff]  }
  0xa4   : > { %1611 = vmatprep.subr.bf16.mxu0 %v4430_v0  ;;  %v4484_v0 = vld [vmem:[#allocation5 + $0x49c] ss:$36 sps:$4 sm:$0xff]  }
  0xa5   : > { %1653 = vmatpush1.bf16.msra.mxu1 %v4509_v39  ;;  %v4518_v39 = vld [vmem:[#allocation5 + $0x20] ss:$36 sps:$4 sm:$0xff]  }
  0xa6   : > { %1654 = vmatprep.subr.bf16.mxu1 %v4516_v42  ;;  %v4829_v42 = vmov 0.0  }
  0xa7   : > { %1612 = vmatpush1.bf16.msra.mxu0 %v4428_v2  ;;  %v4531_v2 = vld [vmem:[#allocation5 + $0x180] ss:$36 sps:$4 sm:$0xff]  }
  0xa8   : > { %1613 = vmatprep.subr.bf16.mxu0 %v4433_v3  ;;  %v4536_v3 = vld [vmem:[#allocation5 + $0x13c] ss:$36 sps:$4 sm:$0xff]  }
  0xa9   : > { %1655 = vmatpush1.bf16.msra.mxu1 %v4514_v44  ;;  %v4561_v44 = vld [vmem:[#allocation5 + $0x330] ss:$36 sps:$4 sm:$0xff]  }
  0xaa   : > { %1656 = vmatprep.subr.bf16.mxu1 %v4521_v48  ;;  %v4567_v48 = vld [vmem:[#allocation5 + $0x2a0] ss:$36 sps:$4 sm:$0xff]  }
  0xab   : > { %1614 = vmatpush1.bf16.msra.mxu0 %v4431_v6  ;;  %v4482_v6 = vld [vmem:[#allocation5 + $0x498] ss:$36 sps:$4 sm:$0xff]  }
  0xac   : > { %1615 = vmatprep.subr.bf16.mxu0 %v4436_v7  ;;  %v4485_v7 = vld [vmem:[#allocation5 + $0x458] ss:$36 sps:$4 sm:$0xff]  }
  0xad   : > { %1657 = vmatpush1.bf16.msra.mxu1 %v4519_v47  ;;  %v4569_v47 = vld [vmem:[#allocation5 + $0x2a4] ss:$36 sps:$4 sm:$0xff]  }
  0xae   : > { %1658 = vmatprep.subr.bf16.mxu1 %v4524_v51  ;;  %v4573_v51 = vld [vmem:[#allocation5 + $0x698] ss:$36 sps:$4 sm:$0xff]  }
  0xaf   : > { %1616 = vmatpush1.bf16.msra.mxu0 %v4434_v9  ;;  %v4534_v9 = vld [vmem:[#allocation5 + $0x138] ss:$36 sps:$4 sm:$0xff]  }
  0xb0   : > { %1617 = vmatprep.subr.bf16.mxu0 %v4439_v10  ;;  %v4539_v10 = vld [vmem:[#allocation5 + $0xf4] ss:$36 sps:$4 sm:$0xff]  }
  0xb1   : > { %1659 = vmatpush1.bf16.msra.mxu1 %v4522_v52  ;;  %v4574_v52 = vld [vmem:[#allocation5 + $0x650] ss:$36 sps:$4 sm:$0xff]  }
  0xb2   : > { %1687 = vmatprep.subr.bf16.mxu1 %v4527_v56 }
  0xb3   : > { %1618 = vmatpush2.bf16.msra.mxu0 %v4437_v11  ;;  %v4486_v11 = vld [vmem:[#allocation5 + $0x218] ss:$36 sps:$4 sm:$0xff]  }
  0xb4   : > { %1619 = vmatprep.subr.bf16.mxu0 %v4442_v12  ;;  %1677 = vmatmul.mubr.bf16.vlgmr.msra.gmra.mxu1 %v4895_v43  ;;  %v4487_v12 = vld [vmem:[#allocation5 + $0x410] ss:$36 sps:$4 sm:$0xff]  }
  0xb5   : > { %1688 = vmatpush1.bf16.msra.mxu1 %v4525_v55  ;;  %1719 = vmatprep.mubr.bf16.mxu1 %v4900_v60  ;;  %v4576_v55 = vld [vmem:[#allocation5 + $0x5c0] ss:$36 sps:$4 sm:$0xff]  }
  0xb6   : > { %1689 = vmatprep.subr.bf16.mxu1 %v4530_v61 }
  0xb7   : > { %1620 = vmatpush2.bf16.msra.mxu0 %v4440_v13  ;;  %v4537_v13 = vld [vmem:[#allocation5 + $0xf0] ss:$36 sps:$4 sm:$0xff]  }
  0xb8   : > { %1621 = vmatprep.subr.bf16.mxu0 %v4445_v14  ;;  %v4542_v14 = vld [vmem:[#allocation5 + $0xac] ss:$36 sps:$4 sm:$0xff]  }
  0xb9   : > { %1690 = vmatpush1.bf16.msra.mxu1 %v4528_v59 }
  0xba   : > { %1691 = vmatprep.subr.bf16.mxu1 %v4533_v62  ;;  %v4578_v62 = vld [vmem:[#allocation5 + $0x530] ss:$36 sps:$4 sm:$0xff]  }
  0xbb   : > { %1622 = vmatpush2.bf16.msra.mxu0 %v4443_v15  ;;  %v4488_v15 = vld [vmem:[#allocation5 + $0x1d0] ss:$36 sps:$4 sm:$0xff]  }
  0xbc   : > { %1623 = vmatprep.subr.bf16.mxu0 %v4448_v16  ;;  %v4492_v16 = vld [vmem:[#allocation5 + $0x3c8] ss:$36 sps:$4 sm:$0xff]  }
  0xbd   : > { %1692 = vmatpush1.bf16.msra.mxu1 %v4531_v2 }
  0xbe   : > { %1693 = vmatprep.subr.bf16.mxu1 %v4536_v3 }
  0xbf   : > { %1624 = vmatpush2.bf16.msra.mxu0 %v4446_v17  ;;  %v4540_v17 = vld [vmem:[#allocation5 + $0xa8] ss:$36 sps:$4 sm:$0xff]  }
  0xc0   : > { %1625 = vmatprep.subr.bf16.mxu0 %v4451_v18  ;;  %v4545_v18 = vld [vmem:[#allocation5 + $0x64] ss:$36 sps:$4 sm:$0xff]  }
  0xc1   : > { %1694 = vmatpush1.bf16.msra.mxu1 %v4534_v9  ;;  %v4580_v9 = vld [vmem:[#allocation5 + $0x4a0] ss:$36 sps:$4 sm:$0xff]  }
  0xc2   : > { %1695 = vmatprep.subr.bf16.mxu1 %v4539_v10 }
  0xc3   : > { %1626 = vmatpush2.bf16.msra.mxu0 %v4449_v23  ;;  %v4548_v23 = vld [vmem:[#allocation5 + $0x1c] ss:$36 sps:$4 sm:$0xff]  }
  0xc4   : > { %1627 = vmatprep.subr.bf16.mxu0 %v4454_v25  ;;  %v4502_v25 = vld [vmem:[#allocation5 + $0x338] ss:$36 sps:$4 sm:$0xff]  }
  0xc5   : > { %1696 = vmatpush1.bf16.msra.mxu1 %v4537_v13 }
  0xc6   : > { %1697 = vmatprep.subr.bf16.mxu1 %v4542_v14 }
  0xc7   : > { %1628 = vmatpush2.bf16.msra.mxu0 %v4452_v27  ;;  %v4503_v27 = vld [vmem:[#allocation5 + $0xf8] ss:$36 sps:$4 sm:$0xff]  }
  0xc8   : > { %1629 = vmatprep.subr.bf16.mxu0 %v4457_v29  ;;  %v4549_v29 = vld [vmem:[#allocation5 + $0x450] ss:$36 sps:$4 sm:$0xff]  }
  0xc9   : > { %1698 = vmatpush1.bf16.msra.mxu1 %v4540_v17 }
  0xca   : > { %1699 = vmatprep.subr.bf16.mxu1 %v4545_v18 }
  0xcb   : > { %1630 = vmatpush2.bf16.msra.mxu0 %v4455_v31  ;;  %v4508_v31 = vld [vmem:[#allocation5 + $0xb0] ss:$36 sps:$4 sm:$0xff]  }
  0xcc   : > { %1631 = vmatprep.subr.bf16.mxu0 %v4460_v33  ;;  %v4552_v33 = vld [vmem:[#allocation5 + $0x408] ss:$36 sps:$4 sm:$0xff]  }
  0xcd   : > { %1700 = vmatpush1.bf16.msra.mxu1 %v4543_v22 }
  0xce   : > { %1701 = vmatprep.subr.bf16.mxu1 %v4548_v23 }
  0xcf   : > { %1632 = vmatpush2.bf16.msra.mxu0 %v4458_v34  ;;  %v4557_v34 = vld [vmem:[#allocation5 + $0x3c4] ss:$36 sps:$4 sm:$0xff]  }
  0xd0   : > { %1730 = vmatprep.subr.bf16.mxu0 %v4463_v35  ;;  %v4513_v35 = vld [vmem:[#allocation5 + $0x68] ss:$36 sps:$4 sm:$0xff]  }
  0xd2   : > { %1634 = vmatmul.mubr.bf16.vlgmr.msra.gmra.mxu0 %v4906_v21 }
  0xd3   : > { %1731 = vmatpush1.bf16.msra.mxu0 %v4461_v36  ;;  %1762 = vmatprep.mubr.bf16.mxu0 %v4828_v8  ;;  %v4517_v36 = vld [vmem:[#allocation5 + $0x260] ss:$36 sps:$4 sm:$0xff]  }
  0xd4   : > { %1732 = vmatprep.subr.bf16.mxu0 %v4466_v37  ;;  %v4555_v37 = vld [vmem:[#allocation5 + $0x3c0] ss:$36 sps:$4 sm:$0xff]  }
  0xd7   : > { %1733 = vmatpush1.bf16.msra.mxu0 %v4464_v40  ;;  %v4558_v40 = vld [vmem:[#allocation5 + $0x378] ss:$36 sps:$4 sm:$0xff]  }
  0xd8   : > { %1734 = vmatprep.subr.bf16.mxu0 %v4469_v41  ;;  %v4563_v41 = vld [vmem:[#allocation5 + $0x334] ss:$36 sps:$4 sm:$0xff]  }
  0xdb   : > { %1735 = vmatpush1.bf16.msra.mxu0 %v4467_v45  ;;  %v4566_v45 = vld [vmem:[#allocation5 + $0x2ec] ss:$36 sps:$4 sm:$0xff]  }
  0xdc   : > { %1736 = vmatprep.subr.bf16.mxu0 %v4472_v46  ;;  %v4564_v46 = vld [vmem:[#allocation5 + $0x2e8] ss:$36 sps:$4 sm:$0xff]  }
  0xdf   : > { %1737 = vmatpush1.bf16.msra.mxu0 %v4470_v49  ;;  %v4572_v49 = vld [vmem:[#allocation5 + $0x25c] ss:$36 sps:$4 sm:$0xff]  }
  0xe0   : > { %1738 = vmatprep.subr.bf16.mxu0 %v4475_v50  ;;  %v4570_v50 = vld [vmem:[#allocation5 + $0x258] ss:$36 sps:$4 sm:$0xff]  }
  0xe3   : > { %1739 = vmatpush1.bf16.msra.mxu0 %v4473_v53  ;;  %v4575_v53 = vld [vmem:[#allocation5 + $0x608] ss:$36 sps:$4 sm:$0xff]  }
  0xe4   : > { %1740 = vmatprep.subr.bf16.mxu0 %v4478_v54 }
  0xe7   : > { %1741 = vmatpush1.bf16.msra.mxu0 %v4476_v57  ;;  %v4577_v57 = vld [vmem:[#allocation5 + $0x578] ss:$36 sps:$4 sm:$0xff]  }
  0xe8   : > { %1742 = vmatprep.subr.bf16.mxu0 %v4481_v58 }
  0xeb   : > { %1743 = vmatpush1.bf16.msra.mxu0 %v4479_v63 }
  0xec   : > { %1744 = vmatprep.subr.bf16.mxu0 %v4484_v0 }
  0xef   : > { %1745 = vmatpush1.bf16.msra.mxu0 %v4482_v6  ;;  %v4579_v6 = vld [vmem:[#allocation5 + $0x4e8] ss:$36 sps:$4 sm:$0xff]  }
  0xf0   : > { %3998 = vmatprep.subr.bf16.mxu0 %v4485_v7 }
  0xf2   : > { %1763 = vmatmul.mubr.bf16.vlgmr.msra.gmra.mxu0 %v4895_v43 }
  0xf3   : > { %3999 = vmatpush3.bf16.msra.mxu0 %v4486_v11  ;;  %1805 = vmatprep.mubr.bf16.mxu0 %v4900_v60  ;;  %v4546_v60 = vld [vmem:[#allocation5 + $0x18] ss:$36 sps:$4 sm:$0xff]  }
  0xf4   : > { %4000 = vmatprep.subr.bf16.mxu0 %v4487_v12  ;;  %1702 = vmatpush1.bf16.msra.mxu1 %v4546_v60 }
  0xf5   : > { %1703 = vmatprep.subr.bf16.mxu1 %v4551_v26 }
  0xf7   : > { %4001 = vmatpush3.bf16.msra.mxu0 %v4488_v15 }
  0xf8   : > { %4002 = vmatprep.subr.bf16.mxu0 %v4492_v16  ;;  %1704 = vmatpush2.bf16.msra.mxu1 %v4549_v29 }
  0xf9   : > { %1705 = vmatprep.subr.bf16.mxu1 %v4554_v30 }
  0xfb   : > { %4003 = vmatpush3.bf16.msra.mxu0 %v4493_v19 }
  0xfc   : > { %4004 = vmatprep.subr.bf16.mxu0 %v4497_v20  ;;  %1706 = vmatpush2.bf16.msra.mxu1 %v4552_v33 }
  0xfd   : > { %1707 = vmatprep.subr.bf16.mxu1 %v4557_v34 }
  0xff   : > { %4005 = vmatpush3.bf16.msra.mxu0 %v4498_v24 }
 0x100   : > { %4006 = vmatprep.subr.bf16.mxu0 %v4502_v25  ;;  %1708 = vmatpush2.bf16.msra.mxu1 %v4555_v37 }
 0x101   : > { %1709 = vmatprep.subr.bf16.mxu1 %v4560_v38 }
 0x103   : > { %4007 = vmatpush3.bf16.msra.mxu0 %v4503_v27 }
 0x104   : > { %4008 = vmatprep.subr.bf16.mxu0 %v4507_v28  ;;  %1710 = vmatpush2.bf16.msra.mxu1 %v4558_v40 }
 0x105   : > { %1711 = vmatprep.subr.bf16.mxu1 %v4563_v41 }
 0x107   : > { %4009 = vmatpush3.bf16.msra.mxu0 %v4508_v31 }
 0x108   : > { %4010 = vmatprep.subr.bf16.mxu0 %v4512_v32  ;;  %1712 = vmatpush2.bf16.msra.mxu1 %v4561_v44 }
 0x109   : > { %1713 = vmatprep.subr.bf16.mxu1 %v4566_v45 }
 0x10b   : > { %4011 = vmatpush3.bf16.msra.mxu0 %v4513_v35 }
 0x10c   : > { %4012 = vmatprep.subr.bf16.mxu0 %v4517_v36  ;;  %1714 = vmatpush2.bf16.msra.mxu1 %v4564_v46 }
 0x10d   : > { %1715 = vmatprep.subr.bf16.mxu1 %v4569_v47 }
 0x10f   : > { %4013 = vmatpush3.bf16.msra.mxu0 %v4518_v39 }
 0x110   : > { %4103 = vmatprep.subr.bf16.mxu0 %v4829_v42  ;;  %1716 = vmatpush2.bf16.msra.mxu1 %v4567_v48 }
 0x111   : > { %1717 = vmatprep.subr.bf16.mxu1 %v4572_v49 }
 0x112   : > { %1806 = vmatmul.mubr.bf16.vlgmr.msra.gmra.mxu0 %v4906_v21 }
 0x113   : > { %4105 = vmatprep.mubr.msk.bf16.mxu0 %vm4830_vm2, %v4829_v42  ;;  %v1506_v54 = vpop.f32.mrf.mxu1 }
 0x114   : > { %1718 = vmatpush2.bf16.msra.mxu1 %v4570_v50 }
 0x115   : > { %4083 = vmatprep.subr.bf16.mxu1 %v4829_v42  ;;  %v1508_v56 = vpop.f32.mrf.mxu1 }
 0x117   : > { %1720 = vmatmul.mubr.bf16.vlgmr.msra.gmra.mxu1 %v4906_v21  ;;  %v1510_v58 = vpop.f32.mrf.mxu1 }
 0x118   : > { %4084 = vmatpush3.bf16.msra.mxu1 %v4573_v51  ;;  %4099 = vmatprep.mubr.msk.bf16.mxu1 %vm4830_vm2, %v4829_v42 }
 0x119   : > { %4085 = vmatprep.subr.bf16.mxu1 %v4829_v42  ;;  %v1512_v0 = vpop.f32.mrf.mxu1 }
 0x11c   : > { %4086 = vmatpush3.bf16.msra.mxu1 %v4574_v52 }
 0x11d   : > { %4087 = vmatprep.subr.bf16.mxu1 %v4829_v42 }
 0x120   : > { %4088 = vmatpush3.bf16.msra.mxu1 %v4575_v53 }
 0x121   : > { %4089 = vmatprep.subr.bf16.mxu1 %v4829_v42 }
 0x124   : > { %4090 = vmatpush3.bf16.msra.mxu1 %v4576_v55 }
 0x125   : > { %4091 = vmatprep.subr.bf16.mxu1 %v4829_v42 }
 0x128   : > { %4092 = vmatpush3.bf16.msra.mxu1 %v4577_v57 }
 0x129   : > { %4093 = vmatprep.subr.bf16.mxu1 %v4829_v42 }
 0x12c   : > { %4094 = vmatpush3.bf16.msra.mxu1 %v4578_v62 }
 0x12d   : > { %4095 = vmatprep.subr.bf16.mxu1 %v4829_v42 }
 0x130   : > { %4096 = vmatpush3.bf16.msra.mxu1 %v4579_v6 }
 0x131   : > { %4097 = vmatprep.subr.bf16.mxu1 %v4829_v42 }
 0x132   : > { %v1463_v21 = vpop.f32.mrf.mxu0 }
 0x133   : > { %v1507_v25 = vadd.f32 %v1506_v54, %v1463_v21 }
 0x134   : > { %v1465_v59 = vpop.f32.mrf.mxu0  ;;  %4098 = vmatpush3.bf16.msra.mxu1 %v4580_v9 }
 0x135   : > { %v1509_v61 = vadd.f32 %v1508_v56, %v1465_v59  ;;  %4109 = vmatprep.subr.bf16.mxu1 %v4829_v42 }
 0x136   : > { %v1467_v63 = vpop.f32.mrf.mxu0 }
 0x137   : > { %4100 = vmatmul.mubr.bf16.vlgmr.msra.gmra.mxu1 %v4895_v43  ;;  %v1511_v24 = vadd.f32 %v1510_v58, %v1467_v63 }
 0x138   : > { %v1469_v2 = vpop.f32.mrf.mxu0  ;;  %4111 = vmatprep.mubr.msk.bf16.mxu1 %vm4830_vm2, %v4829_v42 }
 0x139   : > { %v1513_v3 = vadd.f32 %v1512_v0, %v1469_v2  ;;  %v1855_v26 = vpack.c.bf16 %v1511_v24, %v1507_v25 }
 0x13b   : > { %v4934_v7 = vpack.c.bf16 %v1513_v3, %v1509_v61 }
 0x152   : > { %v1592_v11 = vpop.f32.mrf.mxu0 }
 0x153   : > { %v1549_v10 = vpop.f32.mrf.mxu1 }
 0x154   : > { %v1593_v12 = vadd.f32 %v1592_v11, %v1549_v10  ;;  %v1594_v14 = vpop.f32.mrf.mxu0 }
 0x155   : > { %v1551_v13 = vpop.f32.mrf.mxu1 }
 0x156   : > { %v1596_v16 = vpop.f32.mrf.mxu0  ;;  %v1595_v20 = vadd.f32 %v1594_v14, %v1551_v13 }
 0x157   : > { %v1553_v15 = vpop.f32.mrf.mxu1 }
 0x158   : > { %v1597_v17 = vadd.f32 %v1596_v16, %v1553_v15  ;;  %v1598_v19 = vpop.f32.mrf.mxu0 }
 0x159   : > { %v1555_v18 = vpop.f32.mrf.mxu1 }
 0x15a   : > { %v4941_v22 = vpack.c.bf16 %v1597_v17, %v1593_v12  ;;  %v1599_v23 = vadd.f32 %v1598_v19, %v1555_v18 }
 0x15c   : > { %v1858_v43 = vpack.c.bf16 %v1599_v23, %v1595_v20 }
 0x15e   : > { %2003 = vrot.lane.b32.xlu0 %v1858_v43, %s4831_s10  ;;  %v1869_v60 = vsel %vm1864_vm3, %v1858_v43, 0 }
 0x15f   : > { %4104 = vmatpush3.bf16.xpose.msra.mxu0 %v1869_v60 }
 0x160   : > { %4115 = vmatprep.subr.bf16.mxu0 %v4829_v42 }
 0x162   : > { %2000 = vrot.lane.b32.xlu0 %v1855_v26, %s4831_s10 }
 0x166   : > { %4106 = vmatmul.mubr.msk.bf16.vlgmr.msra.gmra.mxu0 %vm1864_vm3, %v1855_v26 }
 0x167   : > { %4117 = vmatprep.mubr.msk.bf16.mxu0 %vm4830_vm2, %v4829_v42 }
 0x174   : > { %v1678_v29 = vpop.f32.mrf.mxu1 }
 0x176   : > { %v1680_v32 = vpop.f32.mrf.mxu1 }
 0x178   : > { %v1682_v34 = vpop.f32.mrf.mxu1 }
 0x17a   : > { %v1684_v37 = vpop.f32.mrf.mxu1 }
 0x192   : > { %v1635_v27 = vpop.f32.mrf.mxu0 }
 0x193   : > { %v1679_v30 = vadd.f32 %v1678_v29, %v1635_v27 }
 0x194   : > { %v1637_v28 = vpop.f32.mrf.mxu0 }
 0x195   : > { %v1681_v33 = vadd.f32 %v1680_v32, %v1637_v28 }
 0x196   : > { %v1639_v31 = vpop.f32.mrf.mxu0 }
 0x197   : > { %v1683_v35 = vadd.f32 %v1682_v34, %v1639_v31 }
 0x198   : > { %v1641_v36 = vpop.f32.mrf.mxu0 }
 0x199   : > { %v4950_v38 = vpack.c.bf16 %v1683_v35, %v1679_v30  ;;  %v1685_v39 = vadd.f32 %v1684_v37, %v1641_v36 }
 0x19b   : > { %v4952_v40 = vpack.c.bf16 %v1685_v39, %v1681_v33 }
 0x1b2   : > { %v1764_v41 = vpop.f32.mrf.mxu0 }
 0x1b4   : > { %v1766_v44 = vpop.f32.mrf.mxu0 }
 0x1b6   : > { %v1768_v45 = vpop.f32.mrf.mxu0 }
 0x1b8   : > { %v1770_v46 = vpop.f32.mrf.mxu0 }
 0x1d0   : > { %v2004_v47 = vpop.permute.xlu0 %2003 }
 0x1d1   : > { %v2009_v48 = vsel %vm1864_vm3, %v2004_v47, 0 }
 0x1d2   : > { %4116 = vmatpush3.bf16.xpose.msra.mxu0 %v2009_v48  ;;  %v4014_v49 = vpop.f32.mrf.mxu0 }
 0x1d4   : > { %v4015_v50 = vpop.f32.mrf.mxu0  ;;  %v2001_v52 = vpop.permute.xlu0 %2000 }
 0x1d5   : > { %v4016_v51 = vadd.f32 %v4015_v50, %v4014_v49 }
 0x1d6   : > { %v4017_v63 = vpop.f32.mrf.mxu0 }
 0x1d7   : > { %v1721_v53 = vpop.f32.mrf.mxu1 }
 0x1d8   : > { %v1765_v55 = vadd.f32 %v1764_v41, %v1721_v53  ;;  %v4018_v0 = vpop.f32.mrf.mxu0 }
 0x1d9   : > { %4118 = vmatmul.mubr.msk.bf16.vlgmr.msra.gmra.mxu0 %vm1864_vm3, %v2001_v52  ;;  %v1723_v54 = vpop.f32.mrf.mxu1  ;;  %v4019_v3 = vadd.f32 %v4018_v0, %v4017_v63  ;;  %v4581_v63 = vld [vmem:[#allocation7 + $0xa8] ss:$12 sps:$4 sm:$0xff]   ;;  %v4583_v0 = vld [vmem:[#allocation7 + $0xac] ss:$12 sps:$4 sm:$0xff]  }
 0x1da   : > { %2241 = vmatprep.mubr.bf16.mxu0 %v4828_v8  ;;  %v1767_v56 = vadd.f32 %v1766_v44, %v1723_v54  ;;  %2217 = vmatprep.subr.bf16.mxu0 %v4583_v0 }
 0x1db   : > { %v1725_v57 = vpop.f32.mrf.mxu1  ;;  %2218 = vmatpush1.bf16.msra.mxu0 %v4581_v63 }
 0x1dc   : > { %v1769_v21 = vadd.f32 %v1768_v45, %v1725_v57 }
 0x1dd   : > { %v1727_v58 = vpop.f32.mrf.mxu1 }
 0x1de   : > { %v4957_v59 = vpack.c.bf16 %v1769_v21, %v1765_v55  ;;  %v1771_v61 = vadd.f32 %v1770_v46, %v1727_v58 }
 0x1e0   : > { %v4959_v62 = vpack.c.bf16 %v1771_v61, %v1767_v56  ;;  %4110 = vmatpush3.bf16.msra.mxu1 %v4957_v59 }
 0x1e1   : > { %4121 = vmatprep.subr.bf16.mxu1 %v4829_v42 }
 0x1f7   : > { %v1848_v2 = vpop.f32.mrf.mxu1 }
 0x1f8   : > { %v1849_v6 = vadd.f32 %v4016_v51, %v1848_v2  ;;  %v4587_v2 = vld [vmem:[#allocation7 + $0x94] ss:$12 sps:$4 sm:$0xff]  }
 0x1f9   : > { %v4101_v9 = vpop.f32.mrf.mxu1  ;;  %2219 = vmatprep.subr.bf16.mxu0 %v4587_v2 }
 0x1fb   : > { %v1851_v10 = vpop.f32.mrf.mxu1 }
 0x1fc   : > { %v1852_v11 = vadd.f32 %v4019_v3, %v1851_v10  ;;  %v4591_v3 = vld [vmem:[#allocation7 + $0x7c] ss:$12 sps:$4 sm:$0xff]  }
 0x1fd   : > { %v4102_v12 = vpop.f32.mrf.mxu1 }
 0x1fe   : > { %v4963_v13 = vpack.c.bf16 %v1852_v11, %v1849_v6  ;;  %v4589_v6 = vld [vmem:[#allocation7 + $0x78] ss:$12 sps:$4 sm:$0xff]  }
 0x226   : > { %v1905_v14 = vpop.f32.mrf.mxu0 }
 0x227   : > { %v1912_v15 = vsel %vm4874_vm0, %v1905_v14, -inf }
 0x228   : > { %v4107_v16 = vpop.f32.mrf.mxu0  ;;  %v1915_v17 = vsel %vm1914_vm4, %v1912_v15, -inf }
 0x229   : > { %1916 = vmax.xlane.f32.xlu1 %v1915_v17  ;;  %v4584_v17 = vld [vmem:[#allocation7 + $0xb0] ss:$12 sps:$4 sm:$0xff]  }
 0x22a   : > { %v1908_v18 = vpop.f32.mrf.mxu0 }
 0x22b   : > { %v1913_v19 = vsel %vm4878_vm1, %v1908_v18, -inf }
 0x22c   : > { %v4108_v20 = vpop.f32.mrf.mxu0  ;;  %v1918_v23 = vsel %vm1914_vm4, %v1913_v19, -inf }
 0x22d   : > { %1919 = vmax.xlane.f32.xlu1 %v1918_v23  ;;  %v4592_v20 = vld [vmem:[#allocation7 + $0x80] ss:$12 sps:$4 sm:$0xff]   ;;  %v4595_v23 = vld [vmem:[#allocation7 + $0x64] ss:$12 sps:$4 sm:$0xff]  }
 0x299   : > { %v2045_v24 = vpop.f32.mrf.mxu0 }
 0x29a   : > { %v2052_v43 = vsel %vm4874_vm0, %v2045_v24, -inf  ;;  %v4593_v24 = vld [vmem:[#allocation7 + $0x60] ss:$12 sps:$4 sm:$0xff]  }
 0x29b   : > { %v4119_v25 = vpop.f32.mrf.mxu0  ;;  %v2054_v60 = vsel %vm1914_vm4, %v2052_v43, -inf }
 0x29c   : > { %2055 = vmax.xlane.f32.xlu0 %v2054_v60  ;;  %v4599_v25 = vld [vmem:[#allocation7 + $0x4c] ss:$12 sps:$4 sm:$0xff]  }
 0x29d   : > { %v2048_v26 = vpop.f32.mrf.mxu0 }
 0x29e   : > { %v2053_v27 = vsel %vm4878_vm1, %v2048_v26, -inf }
 0x29f   : > { %v4120_v28 = vpop.f32.mrf.mxu0  ;;  %v2057_v29 = vsel %vm1914_vm4, %v2053_v27, -inf }
 0x2a0   : > { %2058 = vmax.xlane.f32.xlu1 %v2057_v29 }
 0x2b2   : > { %v1917_v30 = vpop.xlane.xlu1 %1916 }
 0x2b3   : > { %v1921_v31 = vsub.f32 %v1912_v15, %v1917_v30 }
 0x2b5   : > { %v1923_v32 = vmul.f32 1.442695, %v1921_v31 }
 0x2b6   : > { %v1920_v33 = vpop.xlane.xlu1 %1919 }
 0x2b7   : > { %4677 = vpow2.f32 %v1923_v32  ;;  %v1922_v34 = vsub.f32 %v1913_v19, %v1920_v33  ;;  %v4588_v19 = vld [vmem:[#allocation7 + $0x98] ss:$12 sps:$4 sm:$0xff]   ;;  %v4597_v33 = vld [vmem:[#allocation7 + $0x48] ss:$12 sps:$4 sm:$0xff]  }
 0x2b9   : > { %v1925_v35 = vmul.f32 1.442695, %v1922_v34  ;;  %v4600_v34 = vld [vmem:[#allocation7 + $0x50] ss:$12 sps:$4 sm:$0xff]  }
 0x2bb   : > { %4679 = vpow2.f32 %v1925_v35 }
 0x2c4   : > { %v4678_v36 = vpop.eup %4677 }
 0x2c5   : > { %v1927_v37 = vsel %vm1914_vm4, %v4678_v36, 0.0 }
 0x2c6   : > { %1928 = vadd.xlane.f32.xlu1 %v1927_v37 }
 0x2c8   : > { %v4680_v39 = vpop.eup %4679 }
 0x2c9   : > { %v1930_v41 = vsel %vm1914_vm4, %v4680_v39, 0.0 }
 0x2ca   : > { %1931 = vadd.xlane.f32.xlu1 %v1930_v41  ;;  %v4604_v41 = vld [vmem:[#allocation7 + $0x38] ss:$12 sps:$4 sm:$0xff]  }
 0x325   : > { %v2056_v44 = vpop.xlane.xlu0 %2055 }
 0x326   : > { %v2060_v45 = vsub.f32 %v2052_v43, %v2056_v44  ;;  %v4596_v43 = vld [vmem:[#allocation7 + $0x68] ss:$12 sps:$4 sm:$0xff]  }
 0x327   : > { %v4607_v44 = vld [vmem:[#allocation7 + $0x1c] ss:$12 sps:$4 sm:$0xff]  }
 0x328   : > { %v2062_v46 = vmul.f32 1.442695, %v2060_v45  ;;  %v4605_v45 = vld [vmem:[#allocation7 + $0x18] ss:$12 sps:$4 sm:$0xff]  }
 0x329   : > { %v2059_v47 = vpop.xlane.xlu1 %2058 }
 0x32a   : > { %4681 = vpow2.f32 %v2062_v46  ;;  %v2061_v48 = vsub.f32 %v2053_v27, %v2059_v47  ;;  %v4608_v46 = vld [vmem:[#allocation7 + $0x20] ss:$12 sps:$4 sm:$0xff]   ;;  %v4611_v47 = vld [vmem:[#allocation7 + $0x4] ss:$12 sps:$4 sm:$0xff]  }
 0x32c   : > { %v2064_v49 = vmul.f32 1.442695, %v2061_v48  ;;  %v4609_v48 = vld [vmem:[#allocation7] ss:$12 sps:$4 sm:$0xff]  }
 0x32e   : > { %4683 = vpow2.f32 %v2064_v49  ;;  %v4612_v49 = vld [vmem:[#allocation7 + $0x8] ss:$12 sps:$4 sm:$0xff]  }
 0x337   : > { %v4682_v50 = vpop.eup %4681 }
 0x338   : > { %v2066_v51 = vsel %vm1914_vm4, %v4682_v50, 0.0 }
 0x339   : > { %2067 = vadd.xlane.f32.xlu1 %v2066_v51 }
 0x33b   : > { %v4684_v52 = vpop.eup %4683 }
 0x33c   : > { %v2069_v53 = vsel %vm1914_vm4, %v4684_v52, 0.0 }
 0x33d   : > { %2070 = vadd.xlane.f32.xlu1 %v2069_v53 }
 0x34e   : > { %2078 = vrot.lane.b32.xlu1 %v4957_v59, %s4831_s10  ;;  %v4585_v59 = vld [vmem:[#allocation7 + $0x90] ss:$12 sps:$4 sm:$0xff]  }
 0x34f   : > { %v1929_v54 = vpop.xlane.xlu1 %1928  ;;  %2220 = vmatpush1.bf16.msra.mxu0 %v4585_v59 }
 0x350   : > { %4685 = vrcp.f32 %v1929_v54  ;;  %2221 = vmatprep.subr.bf16.mxu0 %v4591_v3 }
 0x353   : > { %v1932_v55 = vpop.xlane.xlu1 %1931  ;;  %2222 = vmatpush1.bf16.msra.mxu0 %v4589_v6 }
 0x354   : > { %4687 = vrcp.f32 %v1932_v55  ;;  %2223 = vmatprep.subr.bf16.mxu0 %v4595_v23 }
 0x357   : > { %2224 = vmatpush1.bf16.msra.mxu0 %v4593_v24 }
 0x358   : > { %2368 = vmatprep.subr.bf16.mxu0 %v4599_v25 }
 0x35d   : > { %v4686_v56 = vpop.eup %4685 }
 0x35e   : > { %v1935_v21 = vmul.f32 %v4686_v56, %v4678_v36  ;;  %v4603_v36 = vld [vmem:[#allocation7 + $0x34] ss:$12 sps:$4 sm:$0xff]  }
 0x361   : > { %v4688_v57 = vpop.eup %4687 }
 0x362   : > { %v1936_v58 = vmul.f32 %v4688_v57, %v4680_v39  ;;  %v4601_v39 = vld [vmem:[#allocation7 + $0x30] ss:$12 sps:$4 sm:$0xff]  }
 0x364   : > { %v1937_v61 = vpack.c.bf16 %v1936_v58, %v1935_v21 }
 0x366   : > { %4112 = vmatmul.mubr.msk.bf16.vlgmr.msra.gmra.mxu1 %vm1914_vm4, %v1937_v61 }
 0x367   : > { %4123 = vmatprep.mubr.msk.bf16.mxu1 %vm4830_vm2, %v4829_v42 }
 0x3c2   : > { %v2068_v9 = vpop.xlane.xlu1 %2067 }
 0x3c3   : > { %4689 = vrcp.f32 %v2068_v9 }
 0x3c6   : > { %v2071_v10 = vpop.xlane.xlu1 %2070 }
 0x3c7   : > { %4691 = vrcp.f32 %v2071_v10 }
 0x3ca   : > { %v2079_v11 = vpop.permute.xlu1 %2078 }
 0x3cb   : > { %4122 = vmatpush3.bf16.msra.mxu1 %v2079_v11 }
 0x3cc   : > { %4127 = vmatprep.subr.bf16.mxu1 %v4829_v42 }
 0x3d0   : > { %v4690_v12 = vpop.eup %4689 }
 0x3d1   : > { %v2074_v15 = vmul.f32 %v4690_v12, %v4682_v50  ;;  %v2448_v50 = vsel %vm1864_vm3, %v4950_v38, 0 }
 0x3d4   : > { %v4692_v14 = vpop.eup %4691 }
 0x3d5   : > { %v2075_v16 = vmul.f32 %v4692_v14, %v4684_v52 }
 0x3d7   : > { %v2076_v18 = vpack.c.bf16 %v2075_v16, %v2074_v15 }
 0x3d9   : > { %4124 = vmatmul.mubr.msk.bf16.vlgmr.msra.gmra.mxu1 %vm1914_vm4, %v2076_v18 }
 0x3da   : > { %4128 = vmatpush3.bf16.msra.mxu1 %v4584_v17  ;;  %4135 = vmatprep.mubr.msk.bf16.mxu1 %vm4830_vm2, %v4829_v42 }
 0x3db   : > { %4129 = vmatprep.subr.bf16.mxu1 %v4829_v42 }
 0x3de   : > { %4130 = vmatpush3.bf16.msra.mxu1 %v4588_v19 }
 0x3df   : > { %4131 = vmatprep.subr.bf16.mxu1 %v4829_v42 }
 0x3e2   : > { %4132 = vmatpush3.bf16.msra.mxu1 %v4592_v20 }
 0x3e3   : > { %4133 = vmatprep.subr.bf16.mxu1 %v4829_v42 }
 0x3e6   : > { %4134 = vmatpush3.bf16.msra.mxu1 %v4596_v43 }
 0x3e7   : > { %4139 = vmatprep.subr.bf16.mxu1 %v4829_v42 }
 0x426   : > { %v1975_v60 = vpop.f32.mrf.mxu1 }
 0x428   : > { %v4113_v26 = vpop.f32.mrf.mxu1 }
 0x42a   : > { %v1978_v27 = vpop.f32.mrf.mxu1 }
 0x42b   : > { %v1982_v28 = vpack.c.bf16 %v1978_v27, %v1975_v60 }
 0x42c   : > { %v4114_v29 = vpop.f32.mrf.mxu1 }
 0x499   : > { %v2118_v30 = vpop.f32.mrf.mxu1 }
 0x49b   : > { %v4125_v31 = vpop.f32.mrf.mxu1 }
 0x49d   : > { %v2121_v32 = vpop.f32.mrf.mxu1 }
 0x49e   : > { %v2125_v35 = vpack.c.bf16 %v2121_v32, %v2118_v30 }
 0x49f   : > { %v4126_v37 = vpop.f32.mrf.mxu1 }
 0x4a0   : > { %3915 = vmatmul.mubr.msk.bf16.vlgmr.msra.gmra.mxu0 %vm1864_vm3, %v2125_v35  ;;  %4136 = vmatmul.mubr.msk.bf16.vlgmr.msra.gmra.mxu1 %vm1864_vm3, %v2125_v35  ;;  %v4615_v35 = vld [vmem:[#allocation7 + $0x10c] ss:$12 sps:$4 sm:$0xff]   ;;  %v4617_v37 = vld [vmem:[#allocation7 + $0xf0] ss:$12 sps:$4 sm:$0xff]  }
 0x4a1   : > { %2369 = vmatpush1.bf16.msra.mxu0 %v4597_v33  ;;  %4140 = vmatpush3.bf16.msra.mxu1 %v4600_v34  ;;  %v4613_v34 = vld [vmem:[#allocation7 + $0x108] ss:$12 sps:$4 sm:$0xff]  }
 0x4a2   : > { %2370 = vmatprep.subr.bf16.mxu0 %v4603_v36  ;;  %4141 = vmatprep.subr.bf16.mxu1 %v4829_v42  ;;  %v4619_v36 = vld [vmem:[#allocation7 + $0xf4] ss:$12 sps:$4 sm:$0xff]  }
 0x4a3   : > { %2392 = vmatprep.mubr.bf16.mxu0 %v4828_v8  ;;  %4147 = vmatprep.mubr.msk.bf16.mxu1 %vm4830_vm2, %v4829_v42 }
 0x4a5   : > { %2371 = vmatpush1.bf16.msra.mxu0 %v4601_v39  ;;  %4142 = vmatpush3.bf16.msra.mxu1 %v4604_v41  ;;  %v4623_v39 = vld [vmem:[#allocation7 + $0xdc] ss:$12 sps:$4 sm:$0xff]   ;;  %v4621_v41 = vld [vmem:[#allocation7 + $0xd8] ss:$12 sps:$4 sm:$0xff]  }
 0x4a6   : > { %2372 = vmatprep.subr.bf16.mxu0 %v4607_v44  ;;  %4143 = vmatprep.subr.bf16.mxu1 %v4829_v42 }
 0x4a9   : > { %2373 = vmatpush1.bf16.msra.mxu0 %v4605_v45  ;;  %4144 = vmatpush3.bf16.msra.mxu1 %v4608_v46 }
 0x4aa   : > { %2374 = vmatprep.subr.bf16.mxu0 %v4611_v47  ;;  %4145 = vmatprep.subr.bf16.mxu1 %v4829_v42 }
 0x4ad   : > { %2375 = vmatpush1.bf16.msra.mxu0 %v4609_v48  ;;  %4146 = vmatpush3.bf16.msra.mxu1 %v4612_v49  ;;  %v4616_v48 = vld [vmem:[#allocation7 + $0x110] ss:$12 sps:$4 sm:$0xff]  }
 0x4ae   : > { %4151 = vmatprep.subr.bf16.mxu0 %v4829_v42  ;;  %4157 = vmatprep.subr.bf16.mxu1 %v4829_v42 }
 0x4b0   : > { %3929 = vmatmul.mubr.msk.bf16.vlgmr.msra.gmra.mxu0 %vm1864_vm3, %v1982_v28  ;;  %4148 = vmatmul.mubr.msk.bf16.vlgmr.msra.gmra.mxu1 %vm1864_vm3, %v1982_v28 }
 0x4b1   : > { %4152 = vmatpush3.bf16.xpose.msra.mxu0 %v2448_v50  ;;  %4158 = vmatpush3.bf16.msra.mxu1 %v4959_v62  ;;  %v4620_v50 = vld [vmem:[#allocation7 + $0xf8] ss:$12 sps:$4 sm:$0xff]  }
 0x4b2   : > { %4153 = vmatprep.mubr.msk.bf16.mxu0 %vm4830_vm2, %v4829_v42  ;;  %4159 = vmatprep.mubr.msk.bf16.mxu1 %vm4830_vm2, %v4829_v42 }
 0x4b3   : > { %4163 = vmatprep.subr.bf16.mxu1 %v4829_v42  ;;  %2652 = vmatprep.subr.bf16.mxu0 %v4615_v35 }
 0x4b8   : > { %4154 = vmatmul.mubr.msk.bf16.vlgmr.msra.gmra.mxu0 %vm1864_vm3, %v4934_v7 }
 0x4b9   : > { %2676 = vmatprep.mubr.bf16.mxu0 %v4828_v8  ;;  %2653 = vmatpush1.bf16.msra.mxu0 %v4613_v34 }
 0x4ba   : > { %2654 = vmatprep.subr.bf16.mxu0 %v4619_v36 }
 0x4bd   : > { %2655 = vmatpush1.bf16.msra.mxu0 %v4617_v37 }
 0x4be   : > { %2656 = vmatprep.subr.bf16.mxu0 %v4623_v39  ;;  %v4629_v39 = vld [vmem:[#allocation7 + $0x168] ss:$12 sps:$4 sm:$0xff]  }
 0x4c1   : > { %2657 = vmatpush1.bf16.msra.mxu0 %v4621_v41  ;;  %v4631_v41 = vld [vmem:[#allocation7 + $0x16c] ss:$12 sps:$4 sm:$0xff]  }
 0x560   : > { %v2286_v51 = vpop.f32.mrf.mxu1  ;;  %v2243_v52 = vpop.f32.mrf.mxu0 }
 0x562   : > { %v4137_v53 = vpop.f32.mrf.mxu1  ;;  %v2245_v55 = vpop.f32.mrf.mxu0 }
 0x563   : > { %v4625_v53 = vld [vmem:[#allocation7 + $0xc0] ss:$12 sps:$4 sm:$0xff]  }
 0x564   : > { %v2289_v54 = vpop.f32.mrf.mxu1  ;;  %v2247_v57 = vpop.f32.mrf.mxu0 }
 0x566   : > { %v4138_v56 = vpop.f32.mrf.mxu1  ;;  %v2249_v21 = vpop.f32.mrf.mxu0 }
 0x570   : > { %v2394_v58 = vpop.f32.mrf.mxu0  ;;  %v2437_v61 = vpop.f32.mrf.mxu1 }
 0x571   : > { %v5017_v63 = vadd.f32 %v2394_v58, %v2243_v52  ;;  %v5019_v0 = vadd.f32 %v2437_v61, %v2286_v51  ;;  %v4624_v51 = vld [vmem:[#allocation7 + $0xe0] ss:$12 sps:$4 sm:$0xff]   ;;  %v4627_v52 = vld [vmem:[#allocation7 + $0xc4] ss:$12 sps:$4 sm:$0xff]  }
 0x572   : > { %v2396_v2 = vpop.f32.mrf.mxu0  ;;  %v4149_v59 = vpop.f32.mrf.mxu1  ;;  %2658 = vmatprep.subr.bf16.mxu0 %v4627_v52  ;;  %v4632_v52 = vld [vmem:[#allocation7 + $0x170] ss:$12 sps:$4 sm:$0xff]  }
 0x573   : > { %v5021_v3 = vadd.f32 %v2396_v2, %v2245_v55  ;;  %2659 = vmatpush1.bf16.msra.mxu0 %v4625_v53 }
 0x574   : > { %v2398_v6 = vpop.f32.mrf.mxu0  ;;  %v2440_v9 = vpop.f32.mrf.mxu1  ;;  %4175 = vmatprep.subr.bf16.mxu0 %v4829_v42 }
 0x575   : > { %v5023_v10 = vadd.f32 %v2398_v6, %v2247_v57  ;;  %v5025_v11 = vadd.f32 %v2440_v9, %v2289_v54  ;;  %v4628_v54 = vld [vmem:[#allocation7 + $0xc8] ss:$12 sps:$4 sm:$0xff]  }
 0x576   : > { %v2400_v12 = vpop.f32.mrf.mxu0  ;;  %v4150_v14 = vpop.f32.mrf.mxu1 }
 0x577   : > { %v5027_v15 = vadd.f32 %v2400_v12, %v2249_v21 }
 0x578   : > { %v2484_v16 = vpop.f32.mrf.mxu0 }
 0x579   : > { %v2491_v17 = vsel %vm4874_vm0, %v2484_v16, -inf }
 0x57a   : > { %v4155_v18 = vpop.f32.mrf.mxu0  ;;  %v2493_v19 = vsel %vm1914_vm4, %v2491_v17, -inf }
 0x57b   : > { %2494 = vmax.xlane.f32.xlu0 %v2493_v19 }
 0x57c   : > { %v2487_v20 = vpop.f32.mrf.mxu0 }
 0x57d   : > { %v2492_v23 = vsel %vm4878_vm1, %v2487_v20, -inf }
 0x57e   : > { %v4156_v24 = vpop.f32.mrf.mxu0  ;;  %v2496_v43 = vsel %vm1914_vm4, %v2492_v23, -inf }
 0x57f   : > { %2497 = vmax.xlane.f32.xlu0 %v2496_v43 }
 0x604   : > { %v2495_v25 = vpop.xlane.xlu0 %2494 }
 0x605   : > { %v2499_v60 = vsub.f32 %v2491_v17, %v2495_v25 }
 0x607   : > { %v2501_v26 = vmul.f32 1.442695, %v2499_v60 }
 0x608   : > { %v2498_v27 = vpop.xlane.xlu0 %2497 }
 0x609   : > { %4693 = vpow2.f32 %v2501_v26  ;;  %v2500_v28 = vsub.f32 %v2492_v23, %v2498_v27 }
 0x60b   : > { %v2503_v29 = vmul.f32 1.442695, %v2500_v28 }
 0x60d   : > { %4695 = vpow2.f32 %v2503_v29 }
 0x616   : > { %v4694_v30 = vpop.eup %4693 }
 0x617   : > { %v2505_v31 = vsel %vm1914_vm4, %v4694_v30, 0.0 }
 0x618   : > { %2506 = vadd.xlane.f32.xlu1 %v2505_v31 }
 0x61a   : > { %v4696_v32 = vpop.eup %4695 }
 0x61b   : > { %v2508_v33 = vsel %vm1914_vm4, %v4696_v32, 0.0 }
 0x61c   : > { %2509 = vadd.xlane.f32.xlu0 %v2508_v33 }
 0x632   : > { %2738 = vrot.lane.b32.xlu0 %v4950_v38, %s4831_s10 }
 0x636   : > { %2735 = vrot.lane.b32.xlu0 %v4934_v7, %s4831_s10 }
 0x6a1   : > { %v2507_v44 = vpop.xlane.xlu1 %2506 }
 0x6a2   : > { %4697 = vrcp.f32 %v2507_v44  ;;  %v4635_v44 = vld [vmem:[#allocation7 + $0x154] ss:$12 sps:$4 sm:$0xff]  }
 0x6a5   : > { %v2510_v45 = vpop.xlane.xlu0 %2509 }
 0x6a6   : > { %4699 = vrcp.f32 %v2510_v45  ;;  %v4633_v45 = vld [vmem:[#allocation7 + $0x150] ss:$12 sps:$4 sm:$0xff]  }
 0x6a9   : > { %v2739_v57 = vpop.permute.xlu0 %2738 }
 0x6aa   : > { %v2744_v2 = vsel %vm1864_vm3, %v2739_v57, 0  ;;  %v4641_v57 = vld [vmem:[#allocation7 + $0x120] ss:$12 sps:$4 sm:$0xff]  }
 0x6ad   : > { %v2736_v59 = vpop.permute.xlu0 %2735 }
 0x6af   : > { %v4698_v38 = vpop.eup %4697 }
 0x6b0   : > { %v2513_v47 = vmul.f32 %v4698_v38, %v4694_v30  ;;  %v4639_v38 = vld [vmem:[#allocation7 + $0x13c] ss:$12 sps:$4 sm:$0xff]  }
 0x6b3   : > { %v4700_v46 = vpop.eup %4699 }
 0x6b4   : > { %v2514_v7 = vmul.f32 %v4700_v46, %v4696_v32  ;;  %v4637_v46 = vld [vmem:[#allocation7 + $0x138] ss:$12 sps:$4 sm:$0xff]  }
 0x6b6   : > { %v2515_v49 = vpack.c.bf16 %v2514_v7, %v2513_v47 }
 0x6b8   : > { %4160 = vmatmul.mubr.msk.bf16.vlgmr.msra.gmra.mxu1 %vm1914_vm4, %v2515_v49 }
 0x6b9   : > { %4164 = vmatpush3.bf16.msra.mxu1 %v4616_v48  ;;  %4171 = vmatprep.mubr.msk.bf16.mxu1 %vm4830_vm2, %v4829_v42 }
 0x6ba   : > { %4165 = vmatprep.subr.bf16.mxu1 %v4829_v42 }
 0x6bd   : > { %4166 = vmatpush3.bf16.msra.mxu1 %v4620_v50 }
 0x6be   : > { %4167 = vmatprep.subr.bf16.mxu1 %v4829_v42 }
 0x6c1   : > { %4168 = vmatpush3.bf16.msra.mxu1 %v4624_v51 }
 0x6c2   : > { %4169 = vmatprep.subr.bf16.mxu1 %v4829_v42 }
 0x6c5   : > { %4170 = vmatpush3.bf16.msra.mxu1 %v4628_v54  ;;  %v4636_v54 = vld [vmem:[#allocation7 + $0x158] ss:$12 sps:$4 sm:$0xff]  }
 0x6c6   : > { %4181 = vmatprep.subr.bf16.mxu1 %v4829_v42 }
 0x778   : > { %v2553_v55 = vpop.f32.mrf.mxu1 }
 0x77a   : > { %v4161_v56 = vpop.f32.mrf.mxu1 }
 0x77b   : > { %v4643_v56 = vld [vmem:[#allocation7 + $0x124] ss:$12 sps:$4 sm:$0xff]  }
 0x77c   : > { %v2556_v21 = vpop.f32.mrf.mxu1 }
 0x77d   : > { %v2560_v58 = vpack.c.bf16 %v2556_v21, %v2553_v55  ;;  %v4640_v55 = vld [vmem:[#allocation7 + $0x140] ss:$12 sps:$4 sm:$0xff]   ;;  %v4644_v21 = vld [vmem:[#allocation7 + $0x128] ss:$12 sps:$4 sm:$0xff]  }
 0x77e   : > { %v4162_v61 = vpop.f32.mrf.mxu1 }
 0x77f   : > { %3945 = vmatmul.mubr.msk.bf16.vlgmr.msra.gmra.mxu0 %vm1864_vm3, %v2560_v58  ;;  %4172 = vmatmul.mubr.msk.bf16.vlgmr.msra.gmra.mxu1 %vm1864_vm3, %v2560_v58 }
 0x780   : > { %4176 = vmatpush3.bf16.xpose.msra.mxu0 %v2744_v2  ;;  %4177 = vmatprep.mubr.msk.bf16.mxu0 %vm4830_vm2, %v4829_v42 }
 0x781   : > { %4183 = vmatprep.mubr.msk.bf16.mxu1 %vm4830_vm2, %v4829_v42  ;;  %2952 = vmatprep.subr.bf16.mxu0 %v4631_v41 }
 0x787   : > { %4178 = vmatmul.mubr.msk.bf16.vlgmr.msra.gmra.mxu0 %vm1864_vm3, %v2736_v59 }
 0x788   : > { %2976 = vmatprep.mubr.bf16.mxu0 %v4828_v8  ;;  %2953 = vmatpush1.bf16.msra.mxu0 %v4629_v39 }
 0x789   : > { %2954 = vmatprep.subr.bf16.mxu0 %v4635_v44  ;;  %v4645_v44 = vld [vmem:[#allocation7 + $0x1c8] ss:$12 sps:$4 sm:$0xff]  }
 0x78c   : > { %2955 = vmatpush1.bf16.msra.mxu0 %v4633_v45  ;;  %v4647_v45 = vld [vmem:[#allocation7 + $0x1cc] ss:$12 sps:$4 sm:$0xff]  }
 0x78d   : > { %2956 = vmatprep.subr.bf16.mxu0 %v4639_v38  ;;  %v4651_v38 = vld [vmem:[#allocation7 + $0x1b4] ss:$12 sps:$4 sm:$0xff]  }
 0x790   : > { %2957 = vmatpush1.bf16.msra.mxu0 %v4637_v46  ;;  %v4649_v46 = vld [vmem:[#allocation7 + $0x1b0] ss:$12 sps:$4 sm:$0xff]  }
 0x791   : > { %2958 = vmatprep.subr.bf16.mxu0 %v4643_v56  ;;  %v4657_v56 = vld [vmem:[#allocation7 + $0x180] ss:$12 sps:$4 sm:$0xff]  }
 0x794   : > { %2959 = vmatpush1.bf16.msra.mxu0 %v4641_v57  ;;  %v4660_v57 = vld [vmem:[#allocation7 + $0x188] ss:$12 sps:$4 sm:$0xff]  }
 0x795   : > { %4199 = vmatprep.subr.bf16.mxu0 %v4829_v42 }
 0x83f   : > { %v2678_v6 = vpop.f32.mrf.mxu0  ;;  %v2721_v9 = vpop.f32.mrf.mxu1 }
 0x840   : > { %v5059_v12 = vadd.f32 %v2678_v6, %v5017_v63  ;;  %v5062_v14 = vadd.f32 %v2721_v9, %v5019_v0  ;;  %v3038_v9 = vsel %vm1864_vm3, %v4952_v40, 0 }
 0x841   : > { %v2680_v16 = vpop.f32.mrf.mxu0  ;;  %v4173_v17 = vpop.f32.mrf.mxu1 }
 0x842   : > { %v5065_v18 = vadd.f32 %v2680_v16, %v5021_v3 }
 0x843   : > { %v2682_v19 = vpop.f32.mrf.mxu0  ;;  %v2724_v20 = vpop.f32.mrf.mxu1 }
 0x844   : > { %v5068_v23 = vadd.f32 %v2682_v19, %v5023_v10  ;;  %v5071_v24 = vadd.f32 %v2724_v20, %v5025_v11 }
 0x845   : > { %v2684_v43 = vpop.f32.mrf.mxu0  ;;  %v4174_v25 = vpop.f32.mrf.mxu1 }
 0x846   : > { %v5074_v63 = vadd.f32 %v2684_v43, %v5027_v15 }
 0x847   : > { %v2780_v0 = vpop.f32.mrf.mxu0 }
 0x848   : > { %v2787_v60 = vsel %vm4874_vm0, %v2780_v0, -inf }
 0x849   : > { %v4179_v26 = vpop.f32.mrf.mxu0  ;;  %v2789_v3 = vsel %vm1914_vm4, %v2787_v60, -inf }
 0x84a   : > { %2790 = vmax.xlane.f32.xlu0 %v2789_v3 }
 0x84b   : > { %v2783_v27 = vpop.f32.mrf.mxu0 }
 0x84c   : > { %v2788_v10 = vsel %vm4878_vm1, %v2783_v27, -inf }
 0x84d   : > { %v4180_v28 = vpop.f32.mrf.mxu0  ;;  %v2792_v11 = vsel %vm1914_vm4, %v2788_v10, -inf }
 0x84e   : > { %2793 = vmax.xlane.f32.xlu1 %v2792_v11 }
 0x8d3   : > { %v2791_v29 = vpop.xlane.xlu0 %2790 }
 0x8d4   : > { %v2795_v30 = vsub.f32 %v2787_v60, %v2791_v29 }
 0x8d6   : > { %v2797_v15 = vmul.f32 1.442695, %v2795_v30 }
 0x8d7   : > { %v2794_v31 = vpop.xlane.xlu1 %2793 }
 0x8d8   : > { %4701 = vpow2.f32 %v2797_v15  ;;  %v2796_v32 = vsub.f32 %v2788_v10, %v2794_v31 }
 0x8da   : > { %v2799_v33 = vmul.f32 1.442695, %v2796_v32 }
 0x8dc   : > { %4703 = vpow2.f32 %v2799_v33 }
 0x8e5   : > { %v4702_v34 = vpop.eup %4701 }
 0x8e6   : > { %v2801_v35 = vsel %vm1914_vm4, %v4702_v34, 0.0 }
 0x8e7   : > { %2802 = vadd.xlane.f32.xlu1 %v2801_v35 }
 0x8e9   : > { %v4704_v36 = vpop.eup %4703 }
 0x8ea   : > { %v2804_v37 = vsel %vm1914_vm4, %v4704_v36, 0.0 }
 0x8eb   : > { %2805 = vadd.xlane.f32.xlu1 %v2804_v37 }
 0x8fc   : > { %2813 = vrot.lane.b32.xlu1 %v4959_v62, %s4831_s10 }
 0x970   : > { %v2803_v47 = vpop.xlane.xlu1 %2802 }
 0x971   : > { %4705 = vrcp.f32 %v2803_v47  ;;  %v4655_v47 = vld [vmem:[#allocation7 + $0x19c] ss:$12 sps:$4 sm:$0xff]  }
 0x974   : > { %v2806_v7 = vpop.xlane.xlu1 %2805 }
 0x975   : > { %4707 = vrcp.f32 %v2806_v7  ;;  %v4653_v7 = vld [vmem:[#allocation7 + $0x198] ss:$12 sps:$4 sm:$0xff]  }
 0x978   : > { %v2814_v48 = vpop.permute.xlu1 %2813 }
 0x979   : > { %4182 = vmatpush3.bf16.msra.mxu1 %v2814_v48 }
 0x97a   : > { %4187 = vmatprep.subr.bf16.mxu1 %v4829_v42 }
 0x97e   : > { %v4706_v62 = vpop.eup %4705 }
 0x97f   : > { %v2809_v50 = vmul.f32 %v4706_v62, %v4702_v34 }
 0x982   : > { %v4708_v49 = vpop.eup %4707 }
 0x983   : > { %v2810_v51 = vmul.f32 %v4708_v49, %v4704_v36 }
 0x985   : > { %v2811_v53 = vpack.c.bf16 %v2810_v51, %v2809_v50  ;;  %v4648_v51 = vld [vmem:[#allocation7 + $0x1d0] ss:$12 sps:$4 sm:$0xff]  }
 0x987   : > { %4184 = vmatmul.mubr.msk.bf16.vlgmr.msra.gmra.mxu1 %vm1914_vm4, %v2811_v53  ;;  %v4652_v53 = vld [vmem:[#allocation7 + $0x1b8] ss:$12 sps:$4 sm:$0xff]  }
 0x988   : > { %4188 = vmatpush3.bf16.msra.mxu1 %v4632_v52  ;;  %4195 = vmatprep.mubr.msk.bf16.mxu1 %vm4830_vm2, %v4829_v42 }
 0x989   : > { %4189 = vmatprep.subr.bf16.mxu1 %v4829_v42 }
 0x98c   : > { %4190 = vmatpush3.bf16.msra.mxu1 %v4636_v54  ;;  %v4656_v54 = vld [vmem:[#allocation7 + $0x1a0] ss:$12 sps:$4 sm:$0xff]  }
 0x98d   : > { %4191 = vmatprep.subr.bf16.mxu1 %v4829_v42 }
 0x990   : > { %4192 = vmatpush3.bf16.msra.mxu1 %v4640_v55  ;;  %v4659_v55 = vld [vmem:[#allocation7 + $0x184] ss:$12 sps:$4 sm:$0xff]  }
 0x991   : > { %4193 = vmatprep.subr.bf16.mxu1 %v4829_v42 }
 0x994   : > { %4194 = vmatpush3.bf16.msra.mxu1 %v4644_v21 }
 0x995   : > { %4205 = vmatprep.subr.bf16.mxu1 %v4829_v42 }
 0xa47   : > { %v2853_v58 = vpop.f32.mrf.mxu1 }
 0xa49   : > { %v4185_v61 = vpop.f32.mrf.mxu1 }
 0xa4b   : > { %v2856_v2 = vpop.f32.mrf.mxu1 }
 0xa4c   : > { %v2860_v59 = vpack.c.bf16 %v2856_v2, %v2853_v58 }
 0xa4d   : > { %v4186_v6 = vpop.f32.mrf.mxu1 }
 0xa4e   : > { %3961 = vmatmul.mubr.msk.bf16.vlgmr.msra.gmra.mxu0 %vm1864_vm3, %v2860_v59  ;;  %4196 = vmatmul.mubr.msk.bf16.vlgmr.msra.gmra.mxu1 %vm1864_vm3, %v2860_v59 }
 0xa4f   : > { %4200 = vmatpush3.bf16.xpose.msra.mxu0 %v3038_v9  ;;  %4206 = vmatpush3.bf16.msra.mxu1 %v4963_v13 }
 0xa50   : > { %4201 = vmatprep.mubr.msk.bf16.mxu0 %vm4830_vm2, %v4829_v42  ;;  %4207 = vmatprep.mubr.msk.bf16.mxu1 %vm4830_vm2, %v4829_v42 }
 0xa51   : > { %4211 = vmatprep.subr.bf16.mxu1 %v4829_v42  ;;  %3242 = vmatprep.subr.bf16.mxu0 %v4647_v45  ;;  %v4663_v45 = vld [vmem:[#allocation7 + $0x22c] ss:$12 sps:$4 sm:$0xff]  }
 0xa56   : > { %4202 = vmatmul.mubr.msk.bf16.vlgmr.msra.gmra.mxu0 %vm1864_vm3, %v4941_v22 }
 0xa57   : > { %3266 = vmatprep.mubr.bf16.mxu0 %v4828_v8  ;;  %3243 = vmatpush1.bf16.msra.mxu0 %v4645_v44  ;;  %v4661_v44 = vld [vmem:[#allocation7 + $0x228] ss:$12 sps:$4 sm:$0xff]  }
 0xa58   : > { %3244 = vmatprep.subr.bf16.mxu0 %v4651_v38  ;;  %v4667_v38 = vld [vmem:[#allocation7 + $0x214] ss:$12 sps:$4 sm:$0xff]  }
 0xa5b   : > { %3245 = vmatpush1.bf16.msra.mxu0 %v4649_v46  ;;  %v4665_v46 = vld [vmem:[#allocation7 + $0x210] ss:$12 sps:$4 sm:$0xff]  }
 0xa5c   : > { %3246 = vmatprep.subr.bf16.mxu0 %v4655_v47  ;;  %v4671_v47 = vld [vmem:[#allocation7 + $0x1fc] ss:$12 sps:$4 sm:$0xff]  }
 0xa5f   : > { %3247 = vmatpush1.bf16.msra.mxu0 %v4653_v7  ;;  %v4669_v7 = vld [vmem:[#allocation7 + $0x1f8] ss:$12 sps:$4 sm:$0xff]  }
 0xa60   : > { %3248 = vmatprep.subr.bf16.mxu0 %v4659_v55  ;;  %v4673_v55 = vld [vmem:[#allocation7 + $0x1e0] ss:$12 sps:$4 sm:$0xff]  }
 0xa63   : > { %3249 = vmatpush1.bf16.msra.mxu0 %v4657_v56  ;;  %v4675_v56 = vld [vmem:[#allocation7 + $0x1e4] ss:$12 sps:$4 sm:$0xff]  }
 0xa64   : > { %4223 = vmatprep.subr.bf16.mxu0 %v4829_v42 }
 0xb0e   : > { %v2978_v16 = vpop.f32.mrf.mxu0  ;;  %v3021_v17 = vpop.f32.mrf.mxu1 }
 0xb0f   : > { %v5109_v19 = vadd.f32 %v2978_v16, %v5059_v12  ;;  %v5112_v20 = vadd.f32 %v3021_v17, %v5062_v14 }
 0xb10   : > { %v2980_v43 = vpop.f32.mrf.mxu0  ;;  %v4197_v25 = vpop.f32.mrf.mxu1 }
 0xb11   : > { %v5115_v0 = vadd.f32 %v2980_v43, %v5065_v18 }
 0xb12   : > { %v2982_v60 = vpop.f32.mrf.mxu0  ;;  %v3024_v26 = vpop.f32.mrf.mxu1 }
 0xb13   : > { %v5118_v3 = vadd.f32 %v2982_v60, %v5068_v23  ;;  %v5121_v27 = vadd.f32 %v3024_v26, %v5071_v24 }
 0xb14   : > { %v2984_v10 = vpop.f32.mrf.mxu0  ;;  %v4198_v28 = vpop.f32.mrf.mxu1 }
 0xb15   : > { %v5124_v12 = vadd.f32 %v2984_v10, %v5074_v63 }
 0xb16   : > { %v3074_v14 = vpop.f32.mrf.mxu0 }
 0xb17   : > { %v3081_v11 = vsel %vm4874_vm0, %v3074_v14, -inf }
 0xb18   : > { %v4203_v29 = vpop.f32.mrf.mxu0  ;;  %v3083_v18 = vsel %vm1914_vm4, %v3081_v11, -inf }
 0xb19   : > { %3084 = vmax.xlane.f32.xlu0 %v3083_v18 }
 0xb1a   : > { %v3077_v30 = vpop.f32.mrf.mxu0 }
 0xb1b   : > { %v3082_v23 = vsel %vm4878_vm1, %v3077_v30, -inf }
 0xb1c   : > { %v4204_v15 = vpop.f32.mrf.mxu0  ;;  %v3086_v24 = vsel %vm1914_vm4, %v3082_v23, -inf }
 0xb1d   : > { %3087 = vmax.xlane.f32.xlu1 %v3086_v24 }
 0xba2   : > { %v3085_v31 = vpop.xlane.xlu0 %3084 }
 0xba3   : > { %v3089_v32 = vsub.f32 %v3081_v11, %v3085_v31 }
 0xba5   : > { %v3091_v63 = vmul.f32 1.442695, %v3089_v32 }
 0xba6   : > { %v3088_v33 = vpop.xlane.xlu1 %3087 }
 0xba7   : > { %4709 = vpow2.f32 %v3091_v63  ;;  %v3090_v34 = vsub.f32 %v3082_v23, %v3088_v33 }
 0xba9   : > { %v3093_v35 = vmul.f32 1.442695, %v3090_v34 }
 0xbab   : > { %4711 = vpow2.f32 %v3093_v35 }
 0xbb4   : > { %v4710_v36 = vpop.eup %4709 }
 0xbb5   : > { %v3095_v37 = vsel %vm1914_vm4, %v4710_v36, 0.0 }
 0xbb6   : > { %3096 = vadd.xlane.f32.xlu0 %v3095_v37 }
 0xbb8   : > { %v4712_v39 = vpop.eup %4711 }
 0xbb9   : > { %v3098_v41 = vsel %vm1914_vm4, %v4712_v39, 0.0 }
 0xbba   : > { %3099 = vadd.xlane.f32.xlu0 %v3098_v41 }
 0xbd0   : > { %3328 = vrot.lane.b32.xlu0 %v4952_v40, %s4831_s10 }
 0xbd4   : > { %3325 = vrot.lane.b32.xlu0 %v4941_v22, %s4831_s10 }
 0xc3f   : > { %v3097_v48 = vpop.xlane.xlu0 %3096 }
 0xc40   : > { %4713 = vrcp.f32 %v3097_v48 }
 0xc43   : > { %v3100_v62 = vpop.xlane.xlu0 %3099 }
 0xc44   : > { %4715 = vrcp.f32 %v3100_v62 }
 0xc47   : > { %v3329_v61 = vpop.permute.xlu0 %3328 }
 0xc48   : > { %v3334_v9 = vsel %vm1864_vm3, %v3329_v61, 0 }
 0xc4b   : > { %v3326_v16 = vpop.permute.xlu0 %3325 }
 0xc4d   : > { %v4714_v40 = vpop.eup %4713 }
 0xc4e   : > { %v3103_v50 = vmul.f32 %v4714_v40, %v4710_v36 }
 0xc51   : > { %v4716_v49 = vpop.eup %4715 }
 0xc52   : > { %v3104_v22 = vmul.f32 %v4716_v49, %v4712_v39 }
 0xc54   : > { %v3105_v52 = vpack.c.bf16 %v3104_v22, %v3103_v50 }
 0xc56   : > { %4208 = vmatmul.mubr.msk.bf16.vlgmr.msra.gmra.mxu1 %vm1914_vm4, %v3105_v52 }
 0xc57   : > { %4212 = vmatpush3.bf16.msra.mxu1 %v4648_v51  ;;  %4219 = vmatprep.mubr.msk.bf16.mxu1 %vm4830_vm2, %v4829_v42  ;;  %v4664_v51 = vld [vmem:[#allocation7 + $0x230] ss:$12 sps:$4 sm:$0xff]  }
 0xc58   : > { %4213 = vmatprep.subr.bf16.mxu1 %v4829_v42 }
 0xc5b   : > { %4214 = vmatpush3.bf16.msra.mxu1 %v4652_v53  ;;  %v4668_v53 = vld [vmem:[#allocation7 + $0x218] ss:$12 sps:$4 sm:$0xff]  }
 0xc5c   : > { %4215 = vmatprep.subr.bf16.mxu1 %v4829_v42 }
 0xc5f   : > { %4216 = vmatpush3.bf16.msra.mxu1 %v4656_v54  ;;  %v4672_v54 = vld [vmem:[#allocation7 + $0x200] ss:$12 sps:$4 sm:$0xff]  }
 0xc60   : > { %4217 = vmatprep.subr.bf16.mxu1 %v4829_v42 }
 0xc63   : > { %4218 = vmatpush3.bf16.msra.mxu1 %v4660_v57  ;;  %v4676_v57 = vld [vmem:[#allocation7 + $0x1e8] ss:$12 sps:$4 sm:$0xff]  }
 0xc64   : > { %4229 = vmatprep.subr.bf16.mxu1 %v4829_v42 }
 0xd16   : > { %v3143_v21 = vpop.f32.mrf.mxu1 }
 0xd18   : > { %v4209_v58 = vpop.f32.mrf.mxu1 }
 0xd1a   : > { %v3146_v2 = vpop.f32.mrf.mxu1 }
 0xd1b   : > { %v3150_v59 = vpack.c.bf16 %v3146_v2, %v3143_v21 }
 0xd1c   : > { %v4210_v6 = vpop.f32.mrf.mxu1 }
 0xd1d   : > { %3977 = vmatmul.mubr.msk.bf16.vlgmr.msra.gmra.mxu0 %vm1864_vm3, %v3150_v59  ;;  %4220 = vmatmul.mubr.msk.bf16.vlgmr.msra.gmra.mxu1 %vm1864_vm3, %v3150_v59  ;;  %v3628_v6 = vsub.s32 0, %v4870_v1 }
 0xd1e   : > { %4224 = vmatpush3.bf16.xpose.msra.mxu0 %v3334_v9  ;;  %4225 = vmatprep.mubr.msk.bf16.mxu0 %vm4830_vm2, %v4829_v42  ;;  %v3636_v9 = vsub.s32 2, %v4870_v1 }
 0xd1f   : > { %4231 = vmatprep.mubr.msk.bf16.mxu1 %vm4830_vm2, %v4829_v42  ;;  %3542 = vmatprep.subr.bf16.mxu0 %v4663_v45 }
 0xd25   : > { %4226 = vmatmul.mubr.msk.bf16.vlgmr.msra.gmra.mxu0 %vm1864_vm3, %v3326_v16  ;;  %v3632_v16 = vsub.s32 1, %v4870_v1 }
 0xd26   : > { %3566 = vmatprep.mubr.bf16.mxu0 %v4828_v8  ;;  %3543 = vmatpush1.bf16.msra.mxu0 %v4661_v44 }
 0xd27   : > { %3544 = vmatprep.subr.bf16.mxu0 %v4667_v38 }
 0xd2a   : > { %3545 = vmatpush1.bf16.msra.mxu0 %v4665_v46 }
 0xd2b   : > { %3546 = vmatprep.subr.bf16.mxu0 %v4671_v47 }
 0xd2e   : > { %3547 = vmatpush1.bf16.msra.mxu0 %v4669_v7 }
 0xd2f   : > { %3548 = vmatprep.subr.bf16.mxu0 %v4675_v56 }
 0xd32   : > { %3549 = vmatpush1.bf16.msra.mxu0 %v4673_v55 }
 0xddd   : > { %v3268_v17 = vpop.f32.mrf.mxu0  ;;  %v3311_v43 = vpop.f32.mrf.mxu1 }
 0xdde   : > { %v5156_v25 = vadd.f32 %v3268_v17, %v5109_v19  ;;  %v5159_v60 = vadd.f32 %v3311_v43, %v5112_v20 }
 0xddf   : > { %v3270_v26 = vpop.f32.mrf.mxu0  ;;  %v4221_v10 = vpop.f32.mrf.mxu1 }
 0xde0   : > { %v5162_v28 = vadd.f32 %v3270_v26, %v5115_v0 }
 0xde1   : > { %v3272_v14 = vpop.f32.mrf.mxu0  ;;  %v3314_v11 = vpop.f32.mrf.mxu1 }
 0xde2   : > { %v5165_v29 = vadd.f32 %v3272_v14, %v5118_v3  ;;  %v5168_v8 = vadd.f32 %v3314_v11, %v5121_v27 }
 0xde3   : > { %v3274_v18 = vpop.f32.mrf.mxu0  ;;  %v4222_v30 = vpop.f32.mrf.mxu1 }
 0xde4   : > { %v5171_v19 = vadd.f32 %v3274_v18, %v5124_v12 }
 0xde5   : > { %v3370_v20 = vpop.f32.mrf.mxu0 }
 0xde6   : > { %v3377_v23 = vsel %vm4874_vm0, %v3370_v20, -inf }
 0xde7   : > { %v4227_v15 = vpop.f32.mrf.mxu0  ;;  %v3379_v0 = vsel %vm1914_vm4, %v3377_v23, -inf }
 0xde8   : > { %3380 = vmax.xlane.f32.xlu0 %v3379_v0 }
 0xde9   : > { %v3373_v24 = vpop.f32.mrf.mxu0 }
 0xdea   : > { %v3378_v3 = vsel %vm4878_vm1, %v3373_v24, -inf }
 0xdeb   : > { %v4228_v31 = vpop.f32.mrf.mxu0  ;;  %v3382_v27 = vsel %vm1914_vm4, %v3378_v3, -inf }
 0xdec   : > { %3383 = vmax.xlane.f32.xlu1 %v3382_v27 }
 0xe71   : > { %v3381_v32 = vpop.xlane.xlu0 %3380 }
 0xe72   : > { %v3385_v63 = vsub.f32 %v3377_v23, %v3381_v32 }
 0xe74   : > { %v3387_v12 = vmul.f32 1.442695, %v3385_v63 }
 0xe75   : > { %v3384_v33 = vpop.xlane.xlu1 %3383 }
 0xe76   : > { %4717 = vpow2.f32 %v3387_v12  ;;  %v3386_v34 = vsub.f32 %v3378_v3, %v3384_v33 }
 0xe78   : > { %v3389_v35 = vmul.f32 1.442695, %v3386_v34 }
 0xe7a   : > { %4719 = vpow2.f32 %v3389_v35 }
 0xe83   : > { %v4718_v36 = vpop.eup %4717 }
 0xe84   : > { %v3391_v37 = vsel %vm1914_vm4, %v4718_v36, 0.0 }
 0xe85   : > { %3392 = vadd.xlane.f32.xlu1 %v3391_v37 }
 0xe87   : > { %v4720_v39 = vpop.eup %4719 }
 0xe88   : > { %v3394_v41 = vsel %vm1914_vm4, %v4720_v39, 0.0 }
 0xe89   : > { %3395 = vadd.xlane.f32.xlu1 %v3394_v41 }
 0xe9a   : > { %3403 = vrot.lane.b32.xlu1 %v4963_v13, %s4831_s10 }
 0xf0e   : > { %v3393_v48 = vpop.xlane.xlu1 %3392 }
 0xf0f   : > { %4721 = vrcp.f32 %v3393_v48 }
 0xf12   : > { %v3396_v62 = vpop.xlane.xlu1 %3395 }
 0xf13   : > { %4723 = vrcp.f32 %v3396_v62 }
 0xf16   : > { %v3404_v40 = vpop.permute.xlu1 %3403 }
 0xf17   : > { %4230 = vmatpush3.bf16.msra.mxu1 %v3404_v40 }
 0xf18   : > { %4235 = vmatprep.subr.bf16.mxu1 %v4829_v42 }
 0xf1c   : > { %v4722_v13 = vpop.eup %4721 }
 0xf1d   : > { %v3399_v50 = vmul.f32 %v4722_v13, %v4718_v36 }
 0xf20   : > { %v4724_v49 = vpop.eup %4723 }
 0xf21   : > { %v3400_v22 = vmul.f32 %v4724_v49, %v4720_v39 }
 0xf23   : > { %v3401_v52 = vpack.c.bf16 %v3400_v22, %v3399_v50 }
 0xf25   : > { %4232 = vmatmul.mubr.msk.bf16.vlgmr.msra.gmra.mxu1 %vm1914_vm4, %v3401_v52 }
 0xf26   : > { %4236 = vmatpush3.bf16.msra.mxu1 %v4664_v51  ;;  %4243 = vmatprep.mubr.msk.bf16.mxu1 %vm4830_vm2, %v4829_v42 }
 0xf27   : > { %4237 = vmatprep.subr.bf16.mxu1 %v4829_v42 }
 0xf2a   : > { %4238 = vmatpush3.bf16.msra.mxu1 %v4668_v53 }
 0xf2b   : > { %4239 = vmatprep.subr.bf16.mxu1 %v4829_v42 }
 0xf2e   : > { %4240 = vmatpush3.bf16.msra.mxu1 %v4672_v54 }
 0xf2f   : > { %4241 = vmatprep.subr.bf16.mxu1 %v4829_v42  ;;  %v3624_v42 = vld [vmem:[%s5218_s3] sm:$0x7] }
 0xf30   : > { %v3629_v17 = vrot.slane %v3624_v42, %v3628_v6  ;;  %v3637_v43 = vrot.slane %v3624_v42, %v3636_v9  ;;  %v3633_v18 = vrot.slane %v3624_v42, %v3632_v16 }
 0xf32   : > { %4242 = vmatpush3.bf16.msra.mxu1 %v4676_v57 }
 0xfe5   : > { %v3443_v21 = vpop.f32.mrf.mxu1 }
 0xfe7   : > { %v4233_v58 = vpop.f32.mrf.mxu1 }
 0xfe9   : > { %v3446_v61 = vpop.f32.mrf.mxu1 }
 0xfea   : > { %v3450_v2 = vpack.c.bf16 %v3446_v61, %v3443_v21 }
 0xfeb   : > { %v4234_v59 = vpop.f32.mrf.mxu1 }
 0xfec   : > { %3993 = vmatmul.mubr.msk.bf16.vlgmr.msra.gmra.mxu0 %vm1864_vm3, %v3450_v2  ;;  %4244 = vmatmul.mubr.msk.bf16.vlgmr.msra.gmra.mxu1 %vm1864_vm3, %v3450_v2 }
0x10ac   : > { %v3568_v26 = vpop.f32.mrf.mxu0  ;;  %v3611_v10 = vpop.f32.mrf.mxu1 }
0x10ad   : > { %v3618_v14 = vadd.f32 %v3568_v26, %v5156_v25  ;;  %v3620_v11 = vadd.f32 %v3611_v10, %v5159_v60 }
0x10ae   : > { %v3570_v30 = vpop.f32.mrf.mxu0  ;;  %v4245_v20 = vpop.f32.mrf.mxu1 }
0x10af   : > { %v3641_v23 = vadd.f32 %v3629_v17, %v3618_v14  ;;  %v3643_v15 = vadd.f32 %v3637_v43, %v3620_v11  ;;  %v3619_v0 = vadd.f32 %v3570_v30, %v5162_v28 }
0x10b0   : > { %v3572_v24 = vpop.f32.mrf.mxu0  ;;  %v3614_v3 = vpop.f32.mrf.mxu1 }
0x10b1   : > { %3649 = vst [vmem:[%s3648_s13] sm:$0xff] %v3641_v23  ;;  %3651 = vst [vmem:[%s3648_s13 + $0x10] sm:$0xff] %v3643_v15  ;;  %v3642_v31 = vadd.f32 %v3633_v18, %v3619_v0  ;;  %v3621_v27 = vadd.f32 %v3572_v24, %v5165_v29  ;;  %v3623_v25 = vadd.f32 %v3614_v3, %v5168_v8 }
0x10b2   : > { %v3574_v32 = vpop.f32.mrf.mxu0  ;;  %v4246_v60 = vpop.f32.mrf.mxu1 }
0x10b3   : > { %3650 = vst [vmem:[%s3648_s13 + $0x8] sm:$0xff] %v3642_v31  ;;  %v3644_v63 = vadd.f32 %v3629_v17, %v3621_v27  ;;  %v3646_v12 = vadd.f32 %v3637_v43, %v3623_v25  ;;  %v3622_v33 = vadd.f32 %v3574_v32, %v5171_v19  ;;  %71 = sbr.rel (!%p69_p1) target bundleno = 48 (0x30), region = 57 }
0x10b5   : > { %3652 = vst [vmem:[%s3648_s13 + $0x18] sm:$0xff] %v3644_v63  ;;  %3654 = vst [vmem:[%s3648_s13 + $0x28] sm:$0xff] %v3646_v12  ;;  %v3645_v28 = vadd.f32 %v3633_v18, %v3622_v33 }
0x10b7   : > { %3653 = vst [vmem:[%s3648_s13 + $0x20] sm:$0xff] %v3645_v28 }
0x10b8   :  { %4796 = shalt.err (!%p4793_p6)
}
0x10b9   :  { %3666 = dma.vmem_to_hbm [thread:$0]  %s3661_s15, 1536, %s5219_s4, [#allocation4], %s4823_s25, %s4823_s25, %s4824_s26  }
0x10ba   :  { %4813 = dma.done.wait [#allocation4], 1536  }
0x10bb   :  { %4814 = vsyncadd [#allocation4], 4294965760 }
0x10bc   :  { %3670 = vsyncpa [#allocation3], 1 }
0x10bd   :  { %3671 = vsyncpa [#allocation6], 1 }
0x10be   :  { %3672 = vsyncpa [#allocation4], 1 }

</bundles_post_ra>
